<compile_context>
chip_gen: v7x
topology: tpu7x:2x2x1
jax: 0.10.0
libtpu: 0.0.40
codegen_flags: <defaults>
</compile_context>

<pallas_src>
import functools

import jax
import jax.numpy as jnp
from jax import lax
from jax.experimental import pallas as pl
from jax.experimental.pallas import tpu as pltpu

BN_EPS = 1e-3  # norm_cfg['eps']

ARCH_SETTINGS = [[1, 16, 1, 1], [6, 24, 2, 2], [6, 32, 3, 2], [6, 64, 4, 2],
                 [6, 96, 3, 1], [6, 160, 3, 2], [6, 320, 1, 1]]
OUT_INDICES = (4, 7)   # 'layer5' and 'conv2'


# ---------------------------------------------------------------------------
# Pallas kernels
# ---------------------------------------------------------------------------

def _pointwise_kernel(*refs, relu6, has_residual):
    """Fused 1x1 conv (MXU, bf16 in / f32 acc) + folded BN + optional ReLU6 + residual."""
    if has_residual:
        x_ref, w_ref, scale_ref, shift_ref, res_ref, o_ref = refs
    else:
        x_ref, w_ref, scale_ref, shift_ref, o_ref = refs

    x = x_ref[0].astype(jnp.bfloat16)                     # (M, Cin)
    y = jnp.dot(x, w_ref[...], preferred_element_type=jnp.float32)  # (M, Cout) f32
    y = y * scale_ref[...] + shift_ref[...]               # folded eval-mode BN
    if relu6:
        y = jnp.clip(y, 0.0, 6.0)
    if has_residual:
        y = y + res_ref[0]
    o_ref[0] = y


def _depthwise_kernel(x_ref, w_ref, scale_ref, shift_ref, o_ref, xpad_ref, *, stride):
    """Depthwise 3x3 conv (pad=1, stride 1 or 2) + folded BN + ReLU6, per image.

    x_ref   : (1, H, W, C)   unpadded activation
    w_ref   : (3, 3, C)      per-channel taps
    scale/shift : (1, 1, C)  folded BN
    o_ref   : (1, Ho, Wo, C)
    xpad_ref: (H+2, W+2, C)  VMEM scratch (zero padding stays on-chip)
    """
    H = x_ref.shape[1]
    W = x_ref.shape[2]
    C = x_ref.shape[3]
    Ho = o_ref.shape[1]
    Wo = o_ref.shape[2]

    # Build the zero-padded activation entirely in VMEM.
    xpad_ref[...] = jnp.zeros_like(xpad_ref)
    xpad_ref[pl.ds(1, H), pl.ds(1, W), :] = x_ref[0]

    w = w_ref[...]                                        # (3, 3, C)
    acc = jnp.zeros((H, W, C), jnp.float32)
    for dy in range(3):
        for dx in range(3):
            win = xpad_ref[pl.ds(dy, H), pl.ds(dx, W), :]          # (H, W, C)
            tap = w[dy:dy + 1, dx:dx + 1, :]                       # (1, 1, C)
            acc = acc + win * tap

    if stride == 2:
        # stride-2 conv == stride-1 conv followed by a 2x spatial subsample,
        # done in VMEM with lane-dim-preserving reshapes (no strided loads).
        acc = acc.reshape(Ho, 2, W, C)[:, 0, :, :]        # keep even rows
        acc = acc.reshape(Ho * Wo, 2, C)[:, 0, :]         # keep even cols
        acc = acc.reshape(Ho, Wo, C)

    y = acc * scale_ref[...] + shift_ref[...]
    o_ref[0] = jnp.clip(y, 0.0, 6.0)


# ---------------------------------------------------------------------------
# Wrappers (jitted so repeated block shapes reuse one compiled kernel)
# ---------------------------------------------------------------------------

@functools.partial(jax.jit, static_argnames=("relu6",))
def pointwise_conv_bn(x, w, scale, shift, residual=None, *, relu6):
    """x: (N, M, Cin) f32 with M = H*W (a free row-major view of NHWC).
    w: (Cin, Cout) f32 (cast to bf16 for the MXU).  residual: optional (N, M, Cout)."""
    N, M, Cin = x.shape
    Cout = w.shape[1]
    w_bf16 = w.astype(jnp.bfloat16)
    has_res = residual is not None

    operands = [x, w_bf16, scale, shift]
    in_specs = [
        pl.BlockSpec((1, M, Cin), lambda n: (n, 0, 0)),
        pl.BlockSpec((Cin, Cout), lambda n: (0, 0)),
        pl.BlockSpec((1, Cout), lambda n: (0, 0)),
        pl.BlockSpec((1, Cout), lambda n: (0, 0)),
    ]
    if has_res:
        operands.append(residual)
        in_specs.append(pl.BlockSpec((1, M, Cout), lambda n: (n, 0, 0)))

    return pl.pallas_call(
        functools.partial(_pointwise_kernel, relu6=relu6, has_residual=has_res),
        out_shape=jax.ShapeDtypeStruct((N, M, Cout), jnp.float32),
        grid_spec=pltpu.PrefetchScalarGridSpec(
            num_scalar_prefetch=0,
            grid=(N,),
            in_specs=in_specs,
            out_specs=pl.BlockSpec((1, M, Cout), lambda n: (n, 0, 0)),
        ),
        compiler_params=pltpu.CompilerParams(
            dimension_semantics=("parallel",)),
    )(*operands)


@functools.partial(jax.jit, static_argnames=("stride",))
def depthwise_conv_bn_relu6(x, w, scale, shift, *, stride):
    """x: (N, H, W, C) f32, w: (3, 3, C), scale/shift: (1, C).  Returns (N, Ho, Wo, C)."""
    N, H, W, C = x.shape
    assert stride in (1, 2)
    if stride == 2:
        # TODO(synk): odd spatial sizes at stride 2 (not hit by MobileNetV2 at /32 inputs).
        assert H % 2 == 0 and W % 2 == 0
    Ho = H if stride == 1 else H // 2
    Wo = W if stride == 1 else W // 2
    scale3 = scale.reshape(1, 1, C)
    shift3 = shift.reshape(1, 1, C)

    return pl.pallas_call(
        functools.partial(_depthwise_kernel, stride=stride),
        out_shape=jax.ShapeDtypeStruct((N, Ho, Wo, C), jnp.float32),
        grid_spec=pltpu.PrefetchScalarGridSpec(
            num_scalar_prefetch=0,
            grid=(N,),
            in_specs=[
                pl.BlockSpec((1, H, W, C), lambda n: (n, 0, 0, 0)),
                pl.BlockSpec((3, 3, C), lambda n: (0, 0, 0)),
                pl.BlockSpec((1, 1, C), lambda n: (0, 0, 0)),
                pl.BlockSpec((1, 1, C), lambda n: (0, 0, 0)),
            ],
            out_specs=pl.BlockSpec((1, Ho, Wo, C), lambda n: (n, 0, 0, 0)),
            scratch_shapes=[pltpu.VMEM((H + 2, W + 2, C), jnp.float32)],
        ),
        compiler_params=pltpu.CompilerParams(
            dimension_semantics=("parallel",)),
    )(x, w, scale3, shift3)


def conv1_3x3_s2(x, w, scale, shift):
    """Network stem: standard 3x3 / stride-2 conv (Cin=3) + BN + ReLU6.

    Implemented as im2col on the tiny 3-channel input (negligible HBM traffic) feeding the
    fused pointwise MXU kernel (27 x Cout matmul + BN + ReLU6).
    """
    N, H, W, Cin = x.shape
    Ho, Wo = H // 2, W // 2
    xp = jnp.pad(x, ((0, 0), (1, 1), (1, 1), (0, 0)))
    taps = []
    for dy in range(3):
        for dx in range(3):
            taps.append(xp[:, dy:dy + 2 * Ho:2, dx:dx + 2 * Wo:2, :])
    patches = jnp.concatenate(taps, axis=-1)              # (N, Ho, Wo, 9*Cin)
    w2d = w.reshape(9 * Cin, -1)                          # (3,3,Cin,Cout) -> (27, Cout)
    y = pointwise_conv_bn(patches.reshape(N, Ho * Wo, 9 * Cin), w2d, scale, shift,
                          relu6=True)
    return y.reshape(N, Ho, Wo, -1)


# ---------------------------------------------------------------------------
# MobileNetV2 forward (Pallas)
# ---------------------------------------------------------------------------

def _inverted_residual(x, blk):
    N, H, W, _ = x.shape
    identity = x
    h = x
    if blk['expand'] is not None:
        e = blk['expand']
        C = h.shape[-1]
        h = pointwise_conv_bn(h.reshape(N, H * W, C), e['w'], e['scale'], e['shift'],
                              relu6=True)
        h = h.reshape(N, H, W, -1)
    d = blk['dw']
    h = depthwise_conv_bn_relu6(h, d['w'], d['scale'], d['shift'], stride=blk['stride'])
    Ho, Wo, Cmid = h.shape[1], h.shape[2], h.shape[3]
    p = blk['project']
    res = identity.reshape(N, Ho * Wo, -1) if blk['use_res'] else None
    h = pointwise_conv_bn(h.reshape(N, Ho * Wo, Cmid), p['w'], p['scale'], p['shift'],
                          residual=res, relu6=False)
    return h.reshape(N, Ho, Wo, -1)


def mobilenet_v2_forward(x_nchw, params):
    """Mirror of MobileNetV2.forward (eval-mode BN).  Returns (out_layer5, out_conv2), NCHW."""
    x = jnp.transpose(x_nchw, (0, 2, 3, 1))               # single boundary NCHW -> NHWC
    c1 = params['conv1']
    x = conv1_3x3_s2(x, c1['w'], c1['scale'], c1['shift'])

    outs = []
    for li, blocks in enumerate(params['layers']):
        for blk in blocks:
            x = _inverted_residual(x, blk)
        if li == OUT_INDICES[0]:                          # after 'layer5'
            outs.append(x)

    N, H, W, C = x.shape
    c2 = params['conv2']
    x = pointwise_conv_bn(x.reshape(N, H * W, C), c2['w'], c2['scale'], c2['shift'],
                          relu6=True).reshape(N, H, W, -1)
    outs.append(x)                                        # 'conv2' (OUT_INDICES[1])
    return tuple(jnp.transpose(o, (0, 3, 1, 2)) for o in outs)


# ---------------------------------------------------------------------------
# Parameters
# ---------------------------------------------------------------------------

def make_divisible(value, divisor=8, min_value=None, min_ratio=0.9):
    if min_value is None:
        min_value = divisor
    new_value = max(min_value, int(value + divisor / 2) // divisor * divisor)
    if new_value < min_ratio * value:
        new_value += divisor
    return new_value


def _init_bn(key, c):
    k1, k2, k3, k4 = jax.random.split(key, 4)
    gamma = 1.0 + 0.1 * jax.random.normal(k1, (c,), jnp.float32)
    beta = 0.1 * jax.random.normal(k2, (c,), jnp.float32)
    mean = 0.1 * jax.random.normal(k3, (c,), jnp.float32)
    var = 1.0 + 0.1 * jax.random.uniform(k4, (c,), jnp.float32)
    return gamma, beta, mean, var


def fold_bn(gamma, beta, mean, var):
    inv_std = 1.0 / jnp.sqrt(var + BN_EPS)
    scale = gamma * inv_std
    shift = beta - mean * scale
    return scale.reshape(1, -1), shift.reshape(1, -1)


def init_mobilenet_v2(key, widen_factor=1.0):
    params = {}
    in_ch = make_divisible(32 * widen_factor, 8)

    key, kw, kb = jax.random.split(key, 3)
    w1 = jax.random.normal(kw, (3, 3, 3, in_ch), jnp.float32) / jnp.sqrt(27.0)
    sc, sh = fold_bn(*_init_bn(kb, in_ch))
    params['conv1'] = {'w': w1, 'scale': sc, 'shift': sh}

    layers = []
    for expand_ratio, channel, num_blocks, stride in ARCH_SETTINGS:
        out_ch = make_divisible(channel * widen_factor, 8)
        blocks = []
        for i in range(num_blocks):
            s = stride if i == 0 else 1
            mid_ch = int(round(in_ch * expand_ratio))
            blk = {'stride': s, 'use_res': (s == 1 and in_ch == out_ch)}
            if expand_ratio != 1:
                key, kw, kb = jax.random.split(key, 3)
                we = jax.random.normal(kw, (in_ch, mid_ch), jnp.float32) / jnp.sqrt(in_ch)
                esc, esh = fold_bn(*_init_bn(kb, mid_ch))
                blk['expand'] = {'w': we, 'scale': esc, 'shift': esh}
            else:
                blk['expand'] = None
            key, kw, kb = jax.random.split(key, 3)
            wd = jax.random.normal(kw, (3, 3, mid_ch), jnp.float32) / 3.0
            dsc, dsh = fold_bn(*_init_bn(kb, mid_ch))
            blk['dw'] = {'w': wd, 'scale': dsc, 'shift': dsh}
            key, kw, kb = jax.random.split(key, 3)
            wp = jax.random.normal(kw, (mid_ch, out_ch), jnp.float32) / jnp.sqrt(mid_ch)
            psc, psh = fold_bn(*_init_bn(kb, out_ch))
            blk['project'] = {'w': wp, 'scale': psc, 'shift': psh}
            blocks.append(blk)
            in_ch = out_ch
        layers.append(blocks)
    params['layers'] = layers

    key, kw, kb = jax.random.split(key, 3)
    w2 = jax.random.normal(kw, (in_ch, 1280), jnp.float32) / jnp.sqrt(in_ch)
    sc, sh = fold_bn(*_init_bn(kb, 1280))
    params['conv2'] = {'w': w2, 'scale': sc, 'shift': sh}
    return params


# ---------------------------------------------------------------------------
# Pure-JAX reference (same eval-mode BN fold; mirrors the deliberate bf16-input /
# f32-accumulate MXU numerics of the 1x1 convs)
# ---------------------------------------------------------------------------

def _ref_pw(x, w, scale, shift, relu6):
    y = jnp.dot(x.astype(jnp.bfloat16), w.astype(jnp.bfloat16),
                preferred_element_type=jnp.float32)
    y = y * scale + shift
    return jnp.clip(y, 0.0, 6.0) if relu6 else y


def _ref_dw(x, w, scale, shift, stride):
    C = x.shape[-1]
    y = lax.conv_general_dilated(
        x, w.reshape(3, 3, 1, C), window_strides=(stride, stride),
        padding=((1, 1), (1, 1)), dimension_numbers=("NHWC", "HWIO", "NHWC"),
        feature_group_count=C)
    return jnp.clip(y * scale + shift, 0.0, 6.0)


def ref_forward(x_nchw, params):
    x = jnp.transpose(x_nchw, (0, 2, 3, 1))
    c1 = params['conv1']
    y = lax.conv_general_dilated(
        x.astype(jnp.bfloat16), c1['w'].astype(jnp.bfloat16), window_strides=(2, 2),
        padding=((1, 1), (1, 1)), dimension_numbers=("NHWC", "HWIO", "NHWC"),
        preferred_element_type=jnp.float32)
    x = jnp.clip(y * c1['scale'] + c1['shift'], 0.0, 6.0)

    outs = []
    for li, blocks in enumerate(params['layers']):
        for blk in blocks:
            identity = x
            h = x
            if blk['expand'] is not None:
                e = blk['expand']
                h = _ref_pw(h, e['w'], e['scale'], e['shift'], relu6=True)
            d = blk['dw']
            h = _ref_dw(h, d['w'], d['scale'], d['shift'], blk['stride'])
            p = blk['project']
            h = _ref_pw(h, p['w'], p['scale'], p['shift'], relu6=False)
            if blk['use_res']:
                h = identity + h
            x = h
        if li == OUT_INDICES[0]:
            outs.append(x)
    c2 = params['conv2']
    x = _ref_pw(x, c2['w'], c2['scale'], c2['shift'], relu6=True)
    outs.append(x)
    return tuple(jnp.transpose(o, (0, 3, 1, 2)) for o in outs)


# ---------------------------------------------------------------------------
# Demo / correctness check
# ---------------------------------------------------------------------------

if __name__ == "__main__":
    key = jax.random.PRNGKey(0)
    key, kin = jax.random.split(key)

    N, H, W = 2, 64, 64
    x = jax.random.normal(kin, (N, 3, H, W), jnp.float32)   # NCHW, like the PyTorch module
    params = init_mobilenet_v2(key)

    outs = mobilenet_v2_forward(x, params)
    jax.block_until_ready(outs)

    assert len(outs) == 2
    assert outs[0].shape == (N, 96, H // 16, W // 16)        # layer5 output
    assert outs[1].shape == (N, 1280, H // 32, W // 32)      # conv2 output

    refs = ref_forward(x, params)
    for o, r in zip(outs, refs):
        assert jnp.allclose(o, r, atol=1e-2, rtol=1e-2), float(jnp.max(jnp.abs(o - r)))

    print("KERNEL_OK")
</pallas_src>

<mosaic_0001>
module attributes {stable_mosaic.version = 11 : i64} {
  func.func @_pointwise_kernel(%arg0: i32, %arg1: memref<1x1024x27xf32, #tpu.memory_space<vmem>>, %arg2: memref<27x32xbf16, #tpu.memory_space<vmem>>, %arg3: memref<1x32xf32, #tpu.memory_space<vmem>>, %arg4: memref<1x32xf32, #tpu.memory_space<vmem>>, %arg5: memref<1x1024x32xf32, #tpu.memory_space<vmem>>) attributes {dimension_semantics = [#tpu.dimension_semantics<parallel>], iteration_bounds = array<i64: 2>, scalar_prefetch = 0 : i64, scratch_operands = 0 : i64, tpu.core_type = #tpu.core_type<tc>, window_params = [{transform_indices = @transform_0, window_bounds = array<i64: 1, 1024, 27>}, {pipeline_mode = #tpu.pipeline_mode<synchronous>, transform_indices = @transform_1, window_bounds = array<i64: 27, 32>}, {pipeline_mode = #tpu.pipeline_mode<synchronous>, transform_indices = @transform_2, window_bounds = array<i64: 1, 32>}, {pipeline_mode = #tpu.pipeline_mode<synchronous>, transform_indices = @transform_3, window_bounds = array<i64: 1, 32>}, {transform_indices = @transform_4, window_bounds = array<i64: 1, 1024, 32>}]} {
    %c0 = arith.constant 0 : index
    %c0_0 = arith.constant 0 : index
    %c0_1 = arith.constant 0 : index
    %0 = vector.load %arg1[%c0, %c0_0, %c0_1] : memref<1x1024x27xf32, #tpu.memory_space<vmem>>, vector<1x1024x27xf32>
    %1 = vector.shape_cast %0 : vector<1x1024x27xf32> to vector<1024x27xf32>
    %2 = arith.truncf %1 : vector<1024x27xf32> to vector<1024x27xbf16>
    %c0_2 = arith.constant 0 : index
    %c0_3 = arith.constant 0 : index
    %3 = vector.load %arg2[%c0_2, %c0_3] : memref<27x32xbf16, #tpu.memory_space<vmem>>, vector<27x32xbf16>
    %cst = arith.constant dense<0.000000e+00> : vector<1024x32xf32>
    %4 = tpu.matmul %2, %3, %cst {dimension_numbers = #tpu.dot_dimension_numbers<[1], [0], [0], [1], [0, 0, 1, 1], [], []>} : vector<1024x27xbf16>, vector<27x32xbf16>, vector<1024x32xf32> -> vector<1024x32xf32>
    %c0_4 = arith.constant 0 : index
    %c0_5 = arith.constant 0 : index
    %5 = vector.load %arg3[%c0_4, %c0_5] : memref<1x32xf32, #tpu.memory_space<vmem>>, vector<1x32xf32>
    %6 = vector.broadcast %5 : vector<1x32xf32> to vector<1024x32xf32>
    %7 = arith.mulf %4, %6 : vector<1024x32xf32>
    %c0_6 = arith.constant 0 : index
    %c0_7 = arith.constant 0 : index
    %8 = vector.load %arg4[%c0_6, %c0_7] : memref<1x32xf32, #tpu.memory_space<vmem>>, vector<1x32xf32>
    %9 = vector.broadcast %8 : vector<1x32xf32> to vector<1024x32xf32>
    %10 = arith.addf %7, %9 : vector<1024x32xf32>
    %cst_8 = arith.constant 0.000000e+00 : f32
    %cst_9 = arith.constant 6.000000e+00 : f32
    %11 = vector.broadcast %cst_8 : f32 to vector<1024x32xf32>
    %12 = arith.maximumf %11, %10 : vector<1024x32xf32>
    %13 = vector.broadcast %cst_9 : f32 to vector<1024x32xf32>
    %14 = arith.minimumf %13, %12 : vector<1024x32xf32>
    %c0_10 = arith.constant 0 : index
    %c0_11 = arith.constant 0 : index
    %c0_12 = arith.constant 0 : index
    %15 = vector.load %arg5[%c0_10, %c0_11, %c0_12] : memref<1x1024x32xf32, #tpu.memory_space<vmem>>, vector<1x1024x32xf32>
    %16 = vector.shape_cast %15 : vector<1x1024x32xf32> to vector<1024x32xf32>
    %17 = vector.shape_cast %14 : vector<1024x32xf32> to vector<1x1024x32xf32>
    tpu.vector_store %arg5[%c0_10, %c0_11, %c0_12], %17 {strides = array<i32>} : memref<1x1024x32xf32, #tpu.memory_space<vmem>>, vector<1x1024x32xf32>,
    return
  }
  func.func @transform_0(%arg0: i32) -> (i32, i32, i32) {
    %c0_i32 = arith.constant 0 : i32
    %c0_i32_0 = arith.constant 0 : i32
    %c0_i32_1 = arith.constant 0 : i32
    return %arg0, %c0_i32, %c0_i32_0 : i32, i32, i32
  }
  func.func @transform_1(%arg0: i32) -> (i32, i32) {
    %c0_i32 = arith.constant 0 : i32
    %c0_i32_0 = arith.constant 0 : i32
    %c0_i32_1 = arith.constant 0 : i32
    return %c0_i32, %c0_i32_0 : i32, i32
  }
  func.func @transform_2(%arg0: i32) -> (i32, i32) {
    %c0_i32 = arith.constant 0 : i32
    %c0_i32_0 = arith.constant 0 : i32
    %c0_i32_1 = arith.constant 0 : i32
    return %c0_i32, %c0_i32_0 : i32, i32
  }
  func.func @transform_3(%arg0: i32) -> (i32, i32) {
    %c0_i32 = arith.constant 0 : i32
    %c0_i32_0 = arith.constant 0 : i32
    %c0_i32_1 = arith.constant 0 : i32
    return %c0_i32, %c0_i32_0 : i32, i32
  }
  func.func @transform_4(%arg0: i32) -> (i32, i32, i32) {
    %c0_i32 = arith.constant 0 : i32
    %c0_i32_0 = arith.constant 0 : i32
    %c0_i32_1 = arith.constant 0 : i32
    return %arg0, %c0_i32, %c0_i32_0 : i32, i32, i32
  }
}

</mosaic_0001>

<bundles_post_ra>
// kernel: pointwise_conv_bn.1
= control target key start
LH: loop header
LB: loop body
LE: loop exit
PB: predicated region body
PF: predicated region fallthrough
CT: control target
= control target key end

     0   :  { %s2191_s15 = smov 0   ;;  %s2949_s0 = inlined_call_operand.vmem [shape: f32[2,1024,27], index: 0, kind: input, shape index: {}]   ;;  %s2950_s1 = inlined_call_operand.vmem [shape: bf16[27,32], index: 1, kind: input, shape index: {}]   ;;  %s2951_s2 = inlined_call_operand.vmem [shape: f32[1,32], index: 2, kind: input, shape index: {}]   ;;  %s2952_s3 = inlined_call_operand.vmem [shape: f32[1,32], index: 3, kind: input, shape index: {}]   ;;  %s2953_s4 = inlined_call_operand.vmem [shape: f32[2,1024,32], index: 4, kind: output, shape index: {}]  }
   0x1 LB: > { %s1861_s16 = sadd.s32 4294967295, %s2163_s15   ;;  %p1865_p0 = scmp.ge.s32.totalorder %s2163_s15, 1  ;;  %s2163_s15 = sphi %s2191_s15, %s14_s15  }
   0x2   : > { %p162_p1 = scmp.lt.s32.totalorder %s2163_s15, 3 }
   0x4   : > { %p163_p2 = pnand %p1865_p0, %p162_p1 }
   0x5   : > { %v2153_v0 = vld [vmem:[%s2950_s1] sm:$0xff] (!%p163_p2)   ;;  %vm599_vm0 = vcmask (!%p163_p2), 1044480   ;;  %v2154_v1 = vld [vmem:[%s2950_s1 + $0x8] sm:$0x3f] (!%p163_p2)   ;;  %vm600_vm1 = vcmask (!%p163_p2), 1045504   ;;  %p188_p3 = scmp.lt.s32.totalorder (!%p163_p2), %s1861_s16, 1 }
   0x6   : > { %166 = sbr.rel (%p163_p2) target bundleno = 366 (0x16e), region = 36  ;;  %2008 = vmatprep.subr.bf16.mxu0 (!%p163_p2), %v2153_v0  ;;  %2140 = vmatprep.subr.bf16.mxu1 (!%p163_p2), %v2153_v0  ;;  %v2165_v2 = vmov (!%p163_p2), 65535   ;;  %vm406_vm2 = vcmask (!%p163_p2), 220160   ;;  %vm1677_vm3 = vcmask (!%p163_p2), 261120  }
   0x7   : > { %2009 = vmatpush3.bf16.msra.mxu0 (!%p163_p2), %v2153_v0  ;;  %2142 = vmatpush3.bf16.msra.mxu1 (!%p163_p2), %v2153_v0  ;;  %v601_v3 = vsel (!%p163_p2), %vm599_vm0, 4294967295, %v2165_v2 }
   0x8   : > { %v602_v4 = vsel (!%p163_p2), %vm600_vm1, %v601_v3, 0 }
   0x9   : > { %v604_v5 = vand.u32 (!%p163_p2), %v2154_v1, %v602_v4 }
   0xb   : > { %2010 = vmatprep.subr.bf16.mxu0 (!%p163_p2), %v604_v5  ;;  %2141 = vmatprep.subr.bf16.mxu1 (!%p163_p2), %v604_v5 }
   0xc   : > { %2011 = vmatpush3.bf16.msra.mxu0 (!%p163_p2), %v604_v5  ;;  %2143 = vmatpush3.bf16.msra.mxu1 (!%p163_p2), %v604_v5 }
   0xd   : > { %s2955_s16 = smov (!%p188_p3, %s1861_s16), 1 }
   0xe   : > { %s1940_s21 = sshll.u32 %s2955_s16, 10 }
   0xf   : > { %s2213_s24 = scalar_lea.vmem %s2949_s0, %s1940_s21  ;;  %s2435_s5 = scalar_lea.vmem %s2953_s4, %s1940_s21 }
  0x10   : > { %v199_v6 = vld [vmem:[%s2213_s24] sm:$0xff]  ;;  %v200_v7 = vld [vmem:[%s2213_s24 + $0x8] sm:$0xff]  ;;  %v201_v11 = vld [vmem:[%s2213_s24 + $0x10] sm:$0xff] }
  0x11   : > { %v263_v8 = vld [vmem:[%s2213_s24 + $0x200] sm:$0xff]  ;;  %v327_v9 = vpack.c.bf16 %v200_v7, %v199_v6  ;;  %v264_v10 = vld [vmem:[%s2213_s24 + $0x208] sm:$0xff]  ;;  %v202_v12 = vld [vmem:[%s2213_s24 + $0x18] sm:$0xff] }
  0x12   : > { %v359_v13 = vpack.c.bf16 %v264_v10, %v263_v8  ;;  %v328_v14 = vpack.c.bf16 %v202_v12, %v201_v11  ;;  %v265_v15 = vld [vmem:[%s2213_s24 + $0x210] sm:$0xff]  ;;  %v266_v16 = vld [vmem:[%s2213_s24 + $0x218] sm:$0xff]  ;;  %v203_v17 = vld [vmem:[%s2213_s24 + $0x20] sm:$0xff] }
  0x13   : > { %2012 = vmatprep.mubr.msk.bf16.mxu0 %vm406_vm2, %v327_v9  ;;  %v360_v18 = vpack.c.bf16 %v266_v16, %v265_v15  ;;  %v204_v19 = vld [vmem:[%s2213_s24 + $0x28] sm:$0xff]  ;;  %v267_v20 = vld [vmem:[%s2213_s24 + $0x220] sm:$0xff]  ;;  %v205_v24 = vld [vmem:[%s2213_s24 + $0x30] sm:$0xff] }
  0x14   : > { %v268_v21 = vld [vmem:[%s2213_s24 + $0x228] sm:$0xff]  ;;  %2076 = vmatprep.mubr.msk.bf16.mxu1 %vm406_vm2, %v359_v13  ;;  %2013 = vmatmul.mubr.msk.bf16.vlgmr.msra.gmra.mrb[0].mxu0 %vm406_vm2, %v328_v14  ;;  %v329_v22 = vpack.c.bf16 %v204_v19, %v203_v17  ;;  %v206_v25 = vld [vmem:[%s2213_s24 + $0x38] sm:$0xff]  ;;  %v269_v26 = vld [vmem:[%s2213_s24 + $0x230] sm:$0xff] }
  0x15   : > { %v361_v23 = vpack.c.bf16 %v268_v21, %v267_v20  ;;  %2077 = vmatmul.mubr.msk.bf16.vlgmr.msra.gmra.mrb[0].mxu1 %vm406_vm2, %v360_v18  ;;  %v270_v27 = vld [vmem:[%s2213_s24 + $0x238] sm:$0xff]  ;;  %v207_v28 = vld [vmem:[%s2213_s24 + $0x40] sm:$0xff]  ;;  %v208_v29 = vld [vmem:[%s2213_s24 + $0x48] sm:$0xff]  ;;  %v330_v32 = vpack.c.bf16 %v206_v25, %v205_v24 }
  0x16   : > { %2016 = vmatprep.mubr.msk.bf16.mxu0 %vm406_vm2, %v329_v22  ;;  %v271_v30 = vld [vmem:[%s2213_s24 + $0x240] sm:$0xff]  ;;  %v272_v31 = vld [vmem:[%s2213_s24 + $0x248] sm:$0xff]  ;;  %v362_v33 = vpack.c.bf16 %v270_v27, %v269_v26  ;;  %v331_v34 = vpack.c.bf16 %v208_v29, %v207_v28  ;;  %v209_v36 = vld [vmem:[%s2213_s24 + $0x50] sm:$0xff] }
  0x17   : > { %2080 = vmatprep.mubr.msk.bf16.mxu1 %vm406_vm2, %v361_v23  ;;  %v363_v35 = vpack.c.bf16 %v272_v31, %v271_v30  ;;  %v210_v37 = vld [vmem:[%s2213_s24 + $0x58] sm:$0xff]  ;;  %v273_v38 = vld [vmem:[%s2213_s24 + $0x250] sm:$0xff]  ;;  %v211_v40 = vld [vmem:[%s2213_s24 + $0x60] sm:$0xff] }
  0x18   : > { %v274_v39 = vld [vmem:[%s2213_s24 + $0x258] sm:$0xff]  ;;  %v212_v41 = vld [vmem:[%s2213_s24 + $0x68] sm:$0xff]  ;;  %v275_v42 = vld [vmem:[%s2213_s24 + $0x260] sm:$0xff]  ;;  %v332_v44 = vpack.c.bf16 %v210_v37, %v209_v36 }
  0x19   : > { %v276_v43 = vld [vmem:[%s2213_s24 + $0x268] sm:$0xff]  ;;  %v364_v45 = vpack.c.bf16 %v274_v39, %v273_v38  ;;  %v333_v46 = vpack.c.bf16 %v212_v41, %v211_v40  ;;  %v213_v48 = vld [vmem:[%s2213_s24 + $0x70] sm:$0xff]  ;;  %v214_v49 = vld [vmem:[%s2213_s24 + $0x78] sm:$0xff] }
  0x1a   : > { %v365_v47 = vpack.c.bf16 %v276_v43, %v275_v42  ;;  %v277_v50 = vld [vmem:[%s2213_s24 + $0x270] sm:$0xff]  ;;  %v278_v51 = vld [vmem:[%s2213_s24 + $0x278] sm:$0xff]  ;;  %v215_v52 = vld [vmem:[%s2213_s24 + $0x80] sm:$0xff]  ;;  %v334_v56 = vpack.c.bf16 %v214_v49, %v213_v48 }
  0x1b   : > { %v216_v53 = vld [vmem:[%s2213_s24 + $0x88] sm:$0xff]  ;;  %v279_v54 = vld [vmem:[%s2213_s24 + $0x280] sm:$0xff]  ;;  %v366_v57 = vpack.c.bf16 %v278_v51, %v277_v50  ;;  %v217_v60 = vld [vmem:[%s2213_s24 + $0x90] sm:$0xff] }
  0x1c   : > { %2017 = vmatmul.mubr.msk.bf16.gmra.mrb[4].mxu0 %vm406_vm2, %v330_v32  ;;  %v280_v55 = vld [vmem:[%s2213_s24 + $0x288] sm:$0xff]  ;;  %v335_v58 = vpack.c.bf16 %v216_v53, %v215_v52  ;;  %v218_v61 = vld [vmem:[%s2213_s24 + $0x98] sm:$0xff]  ;;  %v281_v62 = vld [vmem:[%s2213_s24 + $0x290] sm:$0xff] }
  0x1d   : > { %2081 = vmatmul.mubr.msk.bf16.gmra.mrb[4].mxu1 %vm406_vm2, %v362_v33  ;;  %2020 = vmatprep.mubr.msk.bf16.mxu0 %vm406_vm2, %v331_v34  ;;  %v367_v59 = vpack.c.bf16 %v280_v55, %v279_v54  ;;  %v282_v63 = vld [vmem:[%s2213_s24 + $0x298] sm:$0xff]  ;;  %v219_v0 = vld [vmem:[%s2213_s24 + $0xa0] sm:$0xff]  ;;  %v220_v1 = vld [vmem:[%s2213_s24 + $0xa8] sm:$0xff]  ;;  %v336_v4 = vpack.c.bf16 %v218_v61, %v217_v60 }
  0x1e   : > { %2084 = vmatprep.mubr.msk.bf16.mxu1 %vm406_vm2, %v363_v35  ;;  %v283_v2 = vld [vmem:[%s2213_s24 + $0x2a0] sm:$0xff]  ;;  %v284_v3 = vld [vmem:[%s2213_s24 + $0x2a8] sm:$0xff]  ;;  %v368_v5 = vpack.c.bf16 %v282_v63, %v281_v62  ;;  %v337_v6 = vpack.c.bf16 %v220_v1, %v219_v0  ;;  %v221_v8 = vld [vmem:[%s2213_s24 + $0xb0] sm:$0xff] }
  0x1f   : > { %v369_v7 = vpack.c.bf16 %v284_v3, %v283_v2  ;;  %v222_v9 = vld [vmem:[%s2213_s24 + $0xb8] sm:$0xff]  ;;  %v285_v10 = vld [vmem:[%s2213_s24 + $0x2b0] sm:$0xff]  ;;  %v223_v12 = vld [vmem:[%s2213_s24 + $0xc0] sm:$0xff] }
  0x20   : > { %v286_v11 = vld [vmem:[%s2213_s24 + $0x2b8] sm:$0xff]  ;;  %v224_v13 = vld [vmem:[%s2213_s24 + $0xc8] sm:$0xff]  ;;  %v287_v14 = vld [vmem:[%s2213_s24 + $0x2c0] sm:$0xff]  ;;  %v338_v16 = vpack.c.bf16 %v222_v9, %v221_v8 }
  0x21   : > { %v288_v15 = vld [vmem:[%s2213_s24 + $0x2c8] sm:$0xff]  ;;  %v370_v17 = vpack.c.bf16 %v286_v11, %v285_v10  ;;  %v339_v18 = vpack.c.bf16 %v224_v13, %v223_v12  ;;  %v225_v20 = vld [vmem:[%s2213_s24 + $0xd0] sm:$0xff]  ;;  %v226_v21 = vld [vmem:[%s2213_s24 + $0xd8] sm:$0xff] }
  0x22   : > { %v371_v19 = vpack.c.bf16 %v288_v15, %v287_v14  ;;  %v289_v22 = vld [vmem:[%s2213_s24 + $0x2d0] sm:$0xff]  ;;  %v290_v23 = vld [vmem:[%s2213_s24 + $0x2d8] sm:$0xff]  ;;  %v227_v24 = vld [vmem:[%s2213_s24 + $0xe0] sm:$0xff]  ;;  %v340_v28 = vpack.c.bf16 %v226_v21, %v225_v20 }
  0x23   : > { %v228_v25 = vld [vmem:[%s2213_s24 + $0xe8] sm:$0xff]  ;;  %v291_v26 = vld [vmem:[%s2213_s24 + $0x2e0] sm:$0xff]  ;;  %v372_v29 = vpack.c.bf16 %v290_v23, %v289_v22  ;;  %v229_v32 = vld [vmem:[%s2213_s24 + $0xf0] sm:$0xff] }
  0x24   : > { %2021 = vmatmul.mubr.msk.bf16.gmra.mrb[8].mxu0 %vm406_vm2, %v332_v44  ;;  %v292_v27 = vld [vmem:[%s2213_s24 + $0x2e8] sm:$0xff]  ;;  %v341_v30 = vpack.c.bf16 %v228_v25, %v227_v24  ;;  %v230_v33 = vld [vmem:[%s2213_s24 + $0xf8] sm:$0xff]  ;;  %v293_v34 = vld [vmem:[%s2213_s24 + $0x2f0] sm:$0xff] }
  0x25   : > { %2085 = vmatmul.mubr.msk.bf16.gmra.mrb[8].mxu1 %vm406_vm2, %v364_v45  ;;  %2024 = vmatprep.mubr.msk.bf16.mxu0 %vm406_vm2, %v333_v46  ;;  %v373_v31 = vpack.c.bf16 %v292_v27, %v291_v26  ;;  %v294_v35 = vld [vmem:[%s2213_s24 + $0x2f8] sm:$0xff]  ;;  %v231_v36 = vld [vmem:[%s2213_s24 + $0x100] sm:$0xff]  ;;  %v232_v37 = vld [vmem:[%s2213_s24 + $0x108] sm:$0xff]  ;;  %v342_v40 = vpack.c.bf16 %v230_v33, %v229_v32 }
  0x26   : > { %2088 = vmatprep.mubr.msk.bf16.mxu1 %vm406_vm2, %v365_v47  ;;  %v295_v38 = vld [vmem:[%s2213_s24 + $0x300] sm:$0xff]  ;;  %v296_v39 = vld [vmem:[%s2213_s24 + $0x308] sm:$0xff]  ;;  %v374_v41 = vpack.c.bf16 %v294_v35, %v293_v34  ;;  %v343_v42 = vpack.c.bf16 %v232_v37, %v231_v36  ;;  %v233_v44 = vld [vmem:[%s2213_s24 + $0x110] sm:$0xff] }
  0x27   : > { %v375_v43 = vpack.c.bf16 %v296_v39, %v295_v38  ;;  %v234_v45 = vld [vmem:[%s2213_s24 + $0x118] sm:$0xff]  ;;  %v297_v46 = vld [vmem:[%s2213_s24 + $0x310] sm:$0xff]  ;;  %v235_v48 = vld [vmem:[%s2213_s24 + $0x120] sm:$0xff] }
  0x28   : > { %v298_v47 = vld [vmem:[%s2213_s24 + $0x318] sm:$0xff]  ;;  %v236_v49 = vld [vmem:[%s2213_s24 + $0x128] sm:$0xff]  ;;  %v299_v50 = vld [vmem:[%s2213_s24 + $0x320] sm:$0xff]  ;;  %v344_v52 = vpack.c.bf16 %v234_v45, %v233_v44 }
  0x29   : > { %v300_v51 = vld [vmem:[%s2213_s24 + $0x328] sm:$0xff]  ;;  %v376_v53 = vpack.c.bf16 %v298_v47, %v297_v46  ;;  %v345_v54 = vpack.c.bf16 %v236_v49, %v235_v48  ;;  %v239_v60 = vld [vmem:[%s2213_s24 + $0x140] sm:$0xff] }
  0x2a   : > { %v377_v55 = vpack.c.bf16 %v300_v51, %v299_v50  ;;  %v240_v61 = vld [vmem:[%s2213_s24 + $0x148] sm:$0xff]  ;;  %v303_v62 = vld [vmem:[%s2213_s24 + $0x340] sm:$0xff] }
  0x2b   : > { %v304_v63 = vld [vmem:[%s2213_s24 + $0x348] sm:$0xff]  ;;  %v347_v2 = vpack.c.bf16 %v240_v61, %v239_v60  ;;  %v243_v8 = vld [vmem:[%s2213_s24 + $0x160] sm:$0xff] }
  0x2c   : > { %2025 = vmatmul.mubr.msk.bf16.gmra.mrb[12].mxu0 %vm406_vm2, %v334_v56  ;;  %v237_v56 = vld [vmem:[%s2213_s24 + $0x130] sm:$0xff]  ;;  %v379_v3 = vpack.c.bf16 %v304_v63, %v303_v62  ;;  %v244_v9 = vld [vmem:[%s2213_s24 + $0x168] sm:$0xff]  ;;  %v307_v10 = vld [vmem:[%s2213_s24 + $0x360] sm:$0xff] }
  0x2d   : > { %2089 = vmatmul.mubr.msk.bf16.gmra.mrb[12].mxu1 %vm406_vm2, %v366_v57  ;;  %2028 = vmatprep.mubr.msk.bf16.mxu0 %vm406_vm2, %v335_v58  ;;  %v238_v57 = vld [vmem:[%s2213_s24 + $0x138] sm:$0xff]  ;;  %v301_v58 = vld [vmem:[%s2213_s24 + $0x330] sm:$0xff]  ;;  %v308_v11 = vld [vmem:[%s2213_s24 + $0x368] sm:$0xff]  ;;  %v349_v14 = vpack.c.bf16 %v244_v9, %v243_v8 }
  0x2e   : > { %2092 = vmatprep.mubr.msk.bf16.mxu1 %vm406_vm2, %v367_v59  ;;  %v302_v59 = vld [vmem:[%s2213_s24 + $0x338] sm:$0xff]  ;;  %v346_v0 = vpack.c.bf16 %v238_v57, %v237_v56  ;;  %v381_v15 = vpack.c.bf16 %v308_v11, %v307_v10  ;;  %v247_v20 = vld [vmem:[%s2213_s24 + $0x180] sm:$0xff]  ;;  %v248_v21 = vld [vmem:[%s2213_s24 + $0x188] sm:$0xff] }
  0x2f   : > { %v378_v1 = vpack.c.bf16 %v302_v59, %v301_v58  ;;  %v311_v22 = vld [vmem:[%s2213_s24 + $0x380] sm:$0xff]  ;;  %v312_v23 = vld [vmem:[%s2213_s24 + $0x388] sm:$0xff]  ;;  %v351_v26 = vpack.c.bf16 %v248_v21, %v247_v20 }
  0x30   : > { %v383_v27 = vpack.c.bf16 %v312_v23, %v311_v22  ;;  %v251_v32 = vld [vmem:[%s2213_s24 + $0x1a0] sm:$0xff]  ;;  %v252_v33 = vld [vmem:[%s2213_s24 + $0x1a8] sm:$0xff] }
  0x31   : > { %v315_v34 = vld [vmem:[%s2213_s24 + $0x3a0] sm:$0xff]  ;;  %v316_v35 = vld [vmem:[%s2213_s24 + $0x3a8] sm:$0xff]  ;;  %v353_v38 = vpack.c.bf16 %v252_v33, %v251_v32 }
  0x32   : > { %v385_v39 = vpack.c.bf16 %v316_v35, %v315_v34  ;;  %v255_v44 = vld [vmem:[%s2213_s24 + $0x1c0] sm:$0xff]  ;;  %v256_v45 = vld [vmem:[%s2213_s24 + $0x1c8] sm:$0xff] }
  0x33   : > { %v319_v46 = vld [vmem:[%s2213_s24 + $0x3c0] sm:$0xff]  ;;  %v320_v47 = vld [vmem:[%s2213_s24 + $0x3c8] sm:$0xff]  ;;  %v355_v50 = vpack.c.bf16 %v256_v45, %v255_v44 }
  0x34   : > { %2029 = vmatmul.mubr.msk.bf16.gmra.mrb[16].mxu0 %vm406_vm2, %v336_v4  ;;  %v241_v4 = vld [vmem:[%s2213_s24 + $0x150] sm:$0xff]  ;;  %v387_v51 = vpack.c.bf16 %v320_v47, %v319_v46  ;;  %v259_v56 = vld [vmem:[%s2213_s24 + $0x1e0] sm:$0xff]  ;;  %v260_v57 = vld [vmem:[%s2213_s24 + $0x1e8] sm:$0xff] }
  0x35   : > { %2093 = vmatmul.mubr.msk.bf16.gmra.mrb[16].mxu1 %vm406_vm2, %v368_v5  ;;  %2032 = vmatprep.mubr.msk.bf16.mxu0 %vm406_vm2, %v337_v6  ;;  %v242_v5 = vld [vmem:[%s2213_s24 + $0x158] sm:$0xff]  ;;  %v305_v6 = vld [vmem:[%s2213_s24 + $0x350] sm:$0xff]  ;;  %v323_v58 = vld [vmem:[%s2213_s24 + $0x3e0] sm:$0xff]  ;;  %v357_v62 = vpack.c.bf16 %v260_v57, %v259_v56 }
  0x36   : > { %2096 = vmatprep.mubr.msk.bf16.mxu1 %vm406_vm2, %v369_v7  ;;  %v306_v7 = vld [vmem:[%s2213_s24 + $0x358] sm:$0xff]  ;;  %v348_v12 = vpack.c.bf16 %v242_v5, %v241_v4  ;;  %v324_v59 = vld [vmem:[%s2213_s24 + $0x3e8] sm:$0xff]  ;;  %v2415_v8 = vld [vmem:[%s2952_s3] ss:$0 sm:$0xff] }
  0x37   : > { %v380_v13 = vpack.c.bf16 %v306_v7, %v305_v6  ;;  %v389_v63 = vpack.c.bf16 %v324_v59, %v323_v58  ;;  %v2410_v6 = vld [vmem:[%s2951_s2] ss:$0 sm:$0xff] }
  0x3c   : > { %2033 = vmatmul.mubr.msk.bf16.gmra.mrb[20].mxu0 %vm406_vm2, %v338_v16  ;;  %v245_v16 = vld [vmem:[%s2213_s24 + $0x170] sm:$0xff] }
  0x3d   : > { %2097 = vmatmul.mubr.msk.bf16.gmra.mrb[20].mxu1 %vm406_vm2, %v370_v17  ;;  %2036 = vmatprep.mubr.msk.bf16.mxu0 %vm406_vm2, %v339_v18  ;;  %v246_v17 = vld [vmem:[%s2213_s24 + $0x178] sm:$0xff]  ;;  %v309_v18 = vld [vmem:[%s2213_s24 + $0x370] sm:$0xff] }
  0x3e   : > { %2100 = vmatprep.mubr.msk.bf16.mxu1 %vm406_vm2, %v371_v19  ;;  %v310_v19 = vld [vmem:[%s2213_s24 + $0x378] sm:$0xff]  ;;  %v350_v24 = vpack.c.bf16 %v246_v17, %v245_v16 }
  0x3f   : > { %v382_v25 = vpack.c.bf16 %v310_v19, %v309_v18 }
  0x44   : > { %2037 = vmatmul.mubr.msk.bf16.gmra.mrb[24].mxu0 %vm406_vm2, %v340_v28  ;;  %v249_v28 = vld [vmem:[%s2213_s24 + $0x190] sm:$0xff] }
  0x45   : > { %2101 = vmatmul.mubr.msk.bf16.gmra.mrb[24].mxu1 %vm406_vm2, %v372_v29  ;;  %2040 = vmatprep.mubr.msk.bf16.mxu0 %vm406_vm2, %v341_v30  ;;  %v250_v29 = vld [vmem:[%s2213_s24 + $0x198] sm:$0xff]  ;;  %v313_v30 = vld [vmem:[%s2213_s24 + $0x390] sm:$0xff] }
  0x46   : > { %2104 = vmatprep.mubr.msk.bf16.mxu1 %vm406_vm2, %v373_v31  ;;  %v314_v31 = vld [vmem:[%s2213_s24 + $0x398] sm:$0xff]  ;;  %v352_v36 = vpack.c.bf16 %v250_v29, %v249_v28 }
  0x47   : > { %v384_v37 = vpack.c.bf16 %v314_v31, %v313_v30 }
  0x4c   : > { %2041 = vmatmul.mubr.msk.bf16.gmra.mrb[28].mxu0 %vm406_vm2, %v342_v40  ;;  %v253_v40 = vld [vmem:[%s2213_s24 + $0x1b0] sm:$0xff] }
  0x4d   : > { %2105 = vmatmul.mubr.msk.bf16.gmra.mrb[28].mxu1 %vm406_vm2, %v374_v41  ;;  %2044 = vmatprep.mubr.msk.bf16.mxu0 %vm406_vm2, %v343_v42  ;;  %v254_v41 = vld [vmem:[%s2213_s24 + $0x1b8] sm:$0xff]  ;;  %v317_v42 = vld [vmem:[%s2213_s24 + $0x3b0] sm:$0xff] }
  0x4e   : > { %2108 = vmatprep.mubr.msk.bf16.mxu1 %vm406_vm2, %v375_v43  ;;  %v318_v43 = vld [vmem:[%s2213_s24 + $0x3b8] sm:$0xff]  ;;  %v354_v48 = vpack.c.bf16 %v254_v41, %v253_v40 }
  0x4f   : > { %v386_v49 = vpack.c.bf16 %v318_v43, %v317_v42 }
  0x54   : > { %2045 = vmatmul.mubr.msk.bf16.gmra.mrb[32].mxu0 %vm406_vm2, %v344_v52  ;;  %v257_v52 = vld [vmem:[%s2213_s24 + $0x1d0] sm:$0xff] }
  0x55   : > { %2109 = vmatmul.mubr.msk.bf16.gmra.mrb[32].mxu1 %vm406_vm2, %v376_v53  ;;  %2048 = vmatprep.mubr.msk.bf16.mxu0 %vm406_vm2, %v345_v54  ;;  %v258_v53 = vld [vmem:[%s2213_s24 + $0x1d8] sm:$0xff]  ;;  %v321_v54 = vld [vmem:[%s2213_s24 + $0x3d0] sm:$0xff] }
  0x56   : > { %2112 = vmatprep.mubr.msk.bf16.mxu1 %vm406_vm2, %v377_v55  ;;  %v322_v55 = vld [vmem:[%s2213_s24 + $0x3d8] sm:$0xff]  ;;  %v356_v60 = vpack.c.bf16 %v258_v53, %v257_v52 }
  0x57   : > { %v388_v61 = vpack.c.bf16 %v322_v55, %v321_v54 }
  0x5c   : > { %2049 = vmatmul.mubr.msk.bf16.gmra.mrb[36].mxu0 %vm406_vm2, %v346_v0  ;;  %v261_v0 = vld [vmem:[%s2213_s24 + $0x1f0] sm:$0xff] }
  0x5d   : > { %2113 = vmatmul.mubr.msk.bf16.gmra.mrb[36].mxu1 %vm406_vm2, %v378_v1  ;;  %2052 = vmatprep.mubr.msk.bf16.mxu0 %vm406_vm2, %v347_v2  ;;  %v262_v1 = vld [vmem:[%s2213_s24 + $0x1f8] sm:$0xff]  ;;  %v325_v2 = vld [vmem:[%s2213_s24 + $0x3f0] sm:$0xff] }
  0x5e   : > { %2116 = vmatprep.mubr.msk.bf16.mxu1 %vm406_vm2, %v379_v3  ;;  %v326_v3 = vld [vmem:[%s2213_s24 + $0x3f8] sm:$0xff]  ;;  %v358_v4 = vpack.c.bf16 %v262_v1, %v261_v0 }
  0x5f   : > { %v390_v5 = vpack.c.bf16 %v326_v3, %v325_v2 }
  0x64   : > { %2053 = vmatmul.mubr.msk.bf16.gmra.mrb[40].mxu0 %vm406_vm2, %v348_v12 }
  0x65   : > { %2117 = vmatmul.mubr.msk.bf16.gmra.mrb[40].mxu1 %vm406_vm2, %v380_v13  ;;  %2056 = vmatprep.mubr.msk.bf16.mxu0 %vm406_vm2, %v349_v14 }
  0x66   : > { %2120 = vmatprep.mubr.msk.bf16.mxu1 %vm406_vm2, %v381_v15 }
  0x6c   : > { %2057 = vmatmul.mubr.msk.bf16.gmra.mrb[44].mxu0 %vm406_vm2, %v350_v24 }
  0x6d   : > { %2121 = vmatmul.mubr.msk.bf16.gmra.mrb[44].mxu1 %vm406_vm2, %v382_v25  ;;  %2060 = vmatprep.mubr.msk.bf16.mxu0 %vm406_vm2, %v351_v26 }
  0x6e   : > { %2124 = vmatprep.mubr.msk.bf16.mxu1 %vm406_vm2, %v383_v27 }
  0x74   : > { %2061 = vmatmul.mubr.msk.bf16.gmra.mrb[48].mxu0 %vm406_vm2, %v352_v36 }
  0x75   : > { %2125 = vmatmul.mubr.msk.bf16.gmra.mrb[48].mxu1 %vm406_vm2, %v384_v37  ;;  %2064 = vmatprep.mubr.msk.bf16.mxu0 %vm406_vm2, %v353_v38 }
  0x76   : > { %2128 = vmatprep.mubr.msk.bf16.mxu1 %vm406_vm2, %v385_v39 }
  0x7c   : > { %2065 = vmatmul.mubr.msk.bf16.gmra.mrb[52].mxu0 %vm406_vm2, %v354_v48 }
  0x7d   : > { %2129 = vmatmul.mubr.msk.bf16.gmra.mrb[52].mxu1 %vm406_vm2, %v386_v49  ;;  %2068 = vmatprep.mubr.msk.bf16.mxu0 %vm406_vm2, %v355_v50 }
  0x7e   : > { %2132 = vmatprep.mubr.msk.bf16.mxu1 %vm406_vm2, %v387_v51 }
  0x84   : > { %2069 = vmatmul.mubr.msk.bf16.gmra.mrb[56].mxu0 %vm406_vm2, %v356_v60 }
  0x85   : > { %2133 = vmatmul.mubr.msk.bf16.gmra.mrb[56].mxu1 %vm406_vm2, %v388_v61  ;;  %2072 = vmatprep.mubr.msk.bf16.mxu0 %vm406_vm2, %v357_v62 }
  0x86   : > { %2136 = vmatprep.mubr.msk.bf16.mxu1 %vm406_vm2, %v389_v63 }
  0x8c   : > { %2073 = vmatmul.mubr.msk.bf16.gmra.mrb[60].mxu0 %vm406_vm2, %v358_v4 }
  0x8d   : > { %2137 = vmatmul.mubr.msk.bf16.gmra.mrb[60].mxu1 %vm406_vm2, %v390_v5 }
  0xe7   : > { %v2014_v7 = vpop.f32.mrb[0].mxu0 }
  0xe8   : > { %v1160_v9 = vmul.f32 %v2014_v7, %v2410_v6  ;;  %v2078_v10 = vpop.f32.mrb[0].mxu1  ;;  %v640_v11 = vpop.f32.mrb[1].mxu0 }
  0xe9   : > { %v1224_v12 = vmul.f32 %v2078_v10, %v2410_v6  ;;  %v1158_v13 = vmul.f32 %v2410_v6, %v640_v11  ;;  %v896_v14 = vpop.f32.mrb[1].mxu1  ;;  %v2015_v15 = vpop.f32.mrb[2].mxu0 }
  0xea   : > { %v1295_v16 = vadd.f32 %v2415_v8, %v1160_v9  ;;  %v1222_v17 = vmul.f32 %v2410_v6, %v896_v14  ;;  %v1161_v18 = vmul.f32 %v2015_v15, %v2410_v6  ;;  %v2079_v19 = vpop.f32.mrb[2].mxu1  ;;  %v643_v20 = vpop.f32.mrb[3].mxu0 }
  0xeb   : > { %v1359_v21 = vadd.f32 %v2415_v8, %v1224_v12  ;;  %v1293_v22 = vadd.f32 %v2415_v8, %v1158_v13  ;;  %v1225_v23 = vmul.f32 %v2079_v19, %v2410_v6  ;;  %v1159_v24 = vmul.f32 %v2410_v6, %v643_v20  ;;  %v899_v25 = vpop.f32.mrb[3].mxu1 }
  0xec   : > { %v1423_v26 = vmax.f32 %v1295_v16, 0.0  ;;  %v1357_v27 = vadd.f32 %v2415_v8, %v1222_v17  ;;  %v1296_v28 = vadd.f32 %v2415_v8, %v1161_v18  ;;  %v1223_v29 = vmul.f32 %v2410_v6, %v899_v25 }
  0xed   : > { %v1487_v30 = vmax.f32 %v1359_v21, 0.0  ;;  %v1421_v31 = vmax.f32 %v1293_v22, 0.0  ;;  %v1360_v32 = vadd.f32 %v2415_v8, %v1225_v23  ;;  %v1294_v33 = vadd.f32 %v2415_v8, %v1159_v24 }
  0xee   : > { %v1551_v34 = vmin.f32 %v1423_v26, 6.0  ;;  %v1485_v35 = vmax.f32 %v1357_v27, 0.0  ;;  %v1424_v36 = vmax.f32 %v1296_v28, 0.0  ;;  %v1358_v37 = vadd.f32 %v2415_v8, %v1223_v29 }
  0xef   : > { %v1615_v38 = vmin.f32 %v1487_v30, 6.0  ;;  %v1549_v39 = vmin.f32 %v1421_v31, 6.0  ;;  %v1488_v40 = vmax.f32 %v1360_v32, 0.0  ;;  %v1422_v41 = vmax.f32 %v1294_v33, 0.0  ;;  %v2018_v42 = vpop.f32.mrb[4].mxu0 }
  0xf0   : > { %1680 = vst.msk [vmem:[%s2435_s5 + $0x10] sm:$0xff] %vm1677_vm3, %v1551_v34  ;;  %v1613_v43 = vmin.f32 %v1485_v35, 6.0  ;;  %v1552_v44 = vmin.f32 %v1424_v36, 6.0  ;;  %v1486_v45 = vmax.f32 %v1358_v37, 0.0  ;;  %v1164_v46 = vmul.f32 %v2018_v42, %v2410_v6  ;;  %v2082_v47 = vpop.f32.mrb[4].mxu1  ;;  %v656_v48 = vpop.f32.mrb[5].mxu0 }
  0xf1   : > { %1744 = vst.msk [vmem:[%s2435_s5 + $0x210] sm:$0xff] %vm1677_vm3, %v1615_v38  ;;  %1678 = vst.msk [vmem:[%s2435_s5] sm:$0xff] %vm1677_vm3, %v1549_v39  ;;  %v1616_v49 = vmin.f32 %v1488_v40, 6.0  ;;  %v1550_v50 = vmin.f32 %v1422_v41, 6.0  ;;  %v1228_v51 = vmul.f32 %v2082_v47, %v2410_v6  ;;  %v1162_v52 = vmul.f32 %v2410_v6, %v656_v48  ;;  %v912_v53 = vpop.f32.mrb[5].mxu1  ;;  %v2019_v54 = vpop.f32.mrb[6].mxu0 }
  0xf2   : > { %1742 = vst.msk [vmem:[%s2435_s5 + $0x200] sm:$0xff] %vm1677_vm3, %v1613_v43  ;;  %1681 = vst.msk [vmem:[%s2435_s5 + $0x18] sm:$0xff] %vm1677_vm3, %v1552_v44  ;;  %v1614_v55 = vmin.f32 %v1486_v45, 6.0  ;;  %v1299_v56 = vadd.f32 %v2415_v8, %v1164_v46  ;;  %v1226_v57 = vmul.f32 %v2410_v6, %v912_v53  ;;  %v1165_v58 = vmul.f32 %v2019_v54, %v2410_v6  ;;  %v2083_v59 = vpop.f32.mrb[6].mxu1  ;;  %v659_v60 = vpop.f32.mrb[7].mxu0 }
  0xf3   : > { %1745 = vst.msk [vmem:[%s2435_s5 + $0x218] sm:$0xff] %vm1677_vm3, %v1616_v49  ;;  %1679 = vst.msk [vmem:[%s2435_s5 + $0x8] sm:$0xff] %vm1677_vm3, %v1550_v50  ;;  %v1363_v61 = vadd.f32 %v2415_v8, %v1228_v51  ;;  %v1297_v62 = vadd.f32 %v2415_v8, %v1162_v52  ;;  %v1229_v63 = vmul.f32 %v2083_v59, %v2410_v6  ;;  %v915_v1 = vpop.f32.mrb[7].mxu1 }
  0xf4   : > { %v1163_v0 = vmul.f32 %v2410_v6, %v659_v60  ;;  %1743 = vst.msk [vmem:[%s2435_s5 + $0x208] sm:$0xff] %vm1677_vm3, %v1614_v55  ;;  %v1427_v2 = vmax.f32 %v1299_v56, 0.0  ;;  %v1361_v3 = vadd.f32 %v2415_v8, %v1226_v57  ;;  %v1300_v4 = vadd.f32 %v2415_v8, %v1165_v58 }
  0xf5   : > { %v1227_v5 = vmul.f32 %v2410_v6, %v915_v1  ;;  %v1491_v7 = vmax.f32 %v1363_v61, 0.0  ;;  %v1425_v9 = vmax.f32 %v1297_v62, 0.0  ;;  %v1364_v10 = vadd.f32 %v2415_v8, %v1229_v63 }
  0xf6   : > { %v1298_v11 = vadd.f32 %v2415_v8, %v1163_v0  ;;  %v1555_v12 = vmin.f32 %v1427_v2, 6.0  ;;  %v1489_v13 = vmax.f32 %v1361_v3, 0.0  ;;  %v1428_v14 = vmax.f32 %v1300_v4, 0.0 }
  0xf7   : > { %v1362_v15 = vadd.f32 %v2415_v8, %v1227_v5  ;;  %v1619_v16 = vmin.f32 %v1491_v7, 6.0  ;;  %v1553_v17 = vmin.f32 %v1425_v9, 6.0  ;;  %v1492_v18 = vmax.f32 %v1364_v10, 0.0  ;;  %v2022_v20 = vpop.f32.mrb[8].mxu0 }
  0xf8   : > { %v1426_v19 = vmax.f32 %v1298_v11, 0.0  ;;  %1684 = vst.msk [vmem:[%s2435_s5 + $0x30] sm:$0xff] %vm1677_vm3, %v1555_v12  ;;  %v1617_v21 = vmin.f32 %v1489_v13, 6.0  ;;  %v1556_v22 = vmin.f32 %v1428_v14, 6.0  ;;  %v1168_v24 = vmul.f32 %v2022_v20, %v2410_v6  ;;  %v2086_v25 = vpop.f32.mrb[8].mxu1  ;;  %v672_v26 = vpop.f32.mrb[9].mxu0 }
  0xf9   : > { %v1490_v23 = vmax.f32 %v1362_v15, 0.0  ;;  %1748 = vst.msk [vmem:[%s2435_s5 + $0x230] sm:$0xff] %vm1677_vm3, %v1619_v16  ;;  %1682 = vst.msk [vmem:[%s2435_s5 + $0x20] sm:$0xff] %vm1677_vm3, %v1553_v17  ;;  %v1620_v27 = vmin.f32 %v1492_v18, 6.0  ;;  %v1232_v29 = vmul.f32 %v2086_v25, %v2410_v6  ;;  %v1166_v30 = vmul.f32 %v2410_v6, %v672_v26  ;;  %v928_v31 = vpop.f32.mrb[9].mxu1  ;;  %v2023_v32 = vpop.f32.mrb[10].mxu0 }
  0xfa   : > { %v1554_v28 = vmin.f32 %v1426_v19, 6.0  ;;  %1746 = vst.msk [vmem:[%s2435_s5 + $0x220] sm:$0xff] %vm1677_vm3, %v1617_v21  ;;  %1685 = vst.msk [vmem:[%s2435_s5 + $0x38] sm:$0xff] %vm1677_vm3, %v1556_v22  ;;  %v1303_v34 = vadd.f32 %v2415_v8, %v1168_v24  ;;  %v1230_v35 = vmul.f32 %v2410_v6, %v928_v31  ;;  %v1169_v36 = vmul.f32 %v2023_v32, %v2410_v6  ;;  %v2087_v37 = vpop.f32.mrb[10].mxu1  ;;  %v675_v38 = vpop.f32.mrb[11].mxu0 }
  0xfb   : > { %v1618_v33 = vmin.f32 %v1490_v23, 6.0  ;;  %1749 = vst.msk [vmem:[%s2435_s5 + $0x238] sm:$0xff] %vm1677_vm3, %v1620_v27  ;;  %v1367_v39 = vadd.f32 %v2415_v8, %v1232_v29  ;;  %v1301_v40 = vadd.f32 %v2415_v8, %v1166_v30  ;;  %v1233_v41 = vmul.f32 %v2087_v37, %v2410_v6  ;;  %v931_v43 = vpop.f32.mrb[11].mxu1 }
  0xfc   : > { %1683 = vst.msk [vmem:[%s2435_s5 + $0x28] sm:$0xff] %vm1677_vm3, %v1554_v28  ;;  %v1167_v42 = vmul.f32 %v2410_v6, %v675_v38  ;;  %v1431_v44 = vmax.f32 %v1303_v34, 0.0  ;;  %v1365_v45 = vadd.f32 %v2415_v8, %v1230_v35  ;;  %v1304_v46 = vadd.f32 %v2415_v8, %v1169_v36 }
  0xfd   : > { %1747 = vst.msk [vmem:[%s2435_s5 + $0x228] sm:$0xff] %vm1677_vm3, %v1618_v33  ;;  %v1231_v47 = vmul.f32 %v2410_v6, %v931_v43  ;;  %v1495_v48 = vmax.f32 %v1367_v39, 0.0  ;;  %v1429_v49 = vmax.f32 %v1301_v40, 0.0  ;;  %v1368_v50 = vadd.f32 %v2415_v8, %v1233_v41 }
  0xfe   : > { %v1302_v51 = vadd.f32 %v2415_v8, %v1167_v42  ;;  %v1559_v52 = vmin.f32 %v1431_v44, 6.0  ;;  %v1493_v53 = vmax.f32 %v1365_v45, 0.0  ;;  %v1432_v54 = vmax.f32 %v1304_v46, 0.0 }
  0xff   : > { %v1366_v55 = vadd.f32 %v2415_v8, %v1231_v47  ;;  %v1623_v56 = vmin.f32 %v1495_v48, 6.0  ;;  %v1557_v57 = vmin.f32 %v1429_v49, 6.0  ;;  %v1496_v58 = vmax.f32 %v1368_v50, 0.0  ;;  %v2026_v60 = vpop.f32.mrb[12].mxu0 }
 0x100   : > { %v1430_v59 = vmax.f32 %v1302_v51, 0.0  ;;  %1688 = vst.msk [vmem:[%s2435_s5 + $0x50] sm:$0xff] %vm1677_vm3, %v1559_v52  ;;  %v1621_v61 = vmin.f32 %v1493_v53, 6.0  ;;  %v1560_v62 = vmin.f32 %v1432_v54, 6.0  ;;  %v1172_v0 = vmul.f32 %v2026_v60, %v2410_v6  ;;  %v2090_v1 = vpop.f32.mrb[12].mxu1  ;;  %v688_v2 = vpop.f32.mrb[13].mxu0 }
 0x101   : > { %v1494_v63 = vmax.f32 %v1366_v55, 0.0  ;;  %1752 = vst.msk [vmem:[%s2435_s5 + $0x250] sm:$0xff] %vm1677_vm3, %v1623_v56  ;;  %1686 = vst.msk [vmem:[%s2435_s5 + $0x40] sm:$0xff] %vm1677_vm3, %v1557_v57  ;;  %v1624_v3 = vmin.f32 %v1496_v58, 6.0  ;;  %v1236_v5 = vmul.f32 %v2090_v1, %v2410_v6  ;;  %v1170_v7 = vmul.f32 %v2410_v6, %v688_v2  ;;  %v944_v9 = vpop.f32.mrb[13].mxu1  ;;  %v2027_v10 = vpop.f32.mrb[14].mxu0 }
 0x102   : > { %v1558_v4 = vmin.f32 %v1430_v59, 6.0  ;;  %1750 = vst.msk [vmem:[%s2435_s5 + $0x240] sm:$0xff] %vm1677_vm3, %v1621_v61  ;;  %1689 = vst.msk [vmem:[%s2435_s5 + $0x58] sm:$0xff] %vm1677_vm3, %v1560_v62  ;;  %v1307_v12 = vadd.f32 %v2415_v8, %v1172_v0  ;;  %v1234_v13 = vmul.f32 %v2410_v6, %v944_v9  ;;  %v1173_v14 = vmul.f32 %v2027_v10, %v2410_v6  ;;  %v2091_v15 = vpop.f32.mrb[14].mxu1  ;;  %v691_v16 = vpop.f32.mrb[15].mxu0 }
 0x103   : > { %v1622_v11 = vmin.f32 %v1494_v63, 6.0  ;;  %1753 = vst.msk [vmem:[%s2435_s5 + $0x258] sm:$0xff] %vm1677_vm3, %v1624_v3  ;;  %v1371_v17 = vadd.f32 %v2415_v8, %v1236_v5  ;;  %v1305_v18 = vadd.f32 %v2415_v8, %v1170_v7  ;;  %v1237_v19 = vmul.f32 %v2091_v15, %v2410_v6  ;;  %v947_v21 = vpop.f32.mrb[15].mxu1 }
 0x104   : > { %1687 = vst.msk [vmem:[%s2435_s5 + $0x48] sm:$0xff] %vm1677_vm3, %v1558_v4  ;;  %v1171_v20 = vmul.f32 %v2410_v6, %v691_v16  ;;  %v1435_v22 = vmax.f32 %v1307_v12, 0.0  ;;  %v1369_v23 = vadd.f32 %v2415_v8, %v1234_v13  ;;  %v1308_v24 = vadd.f32 %v2415_v8, %v1173_v14 }
 0x105   : > { %1751 = vst.msk [vmem:[%s2435_s5 + $0x248] sm:$0xff] %vm1677_vm3, %v1622_v11  ;;  %v1235_v25 = vmul.f32 %v2410_v6, %v947_v21  ;;  %v1499_v26 = vmax.f32 %v1371_v17, 0.0  ;;  %v1433_v27 = vmax.f32 %v1305_v18, 0.0  ;;  %v1372_v28 = vadd.f32 %v2415_v8, %v1237_v19 }
 0x106   : > { %v1306_v29 = vadd.f32 %v2415_v8, %v1171_v20  ;;  %v1563_v30 = vmin.f32 %v1435_v22, 6.0  ;;  %v1497_v31 = vmax.f32 %v1369_v23, 0.0  ;;  %v1436_v32 = vmax.f32 %v1308_v24, 0.0 }
 0x107   : > { %v1370_v33 = vadd.f32 %v2415_v8, %v1235_v25  ;;  %v1627_v34 = vmin.f32 %v1499_v26, 6.0  ;;  %v1561_v35 = vmin.f32 %v1433_v27, 6.0  ;;  %v1500_v36 = vmax.f32 %v1372_v28, 0.0  ;;  %v2030_v38 = vpop.f32.mrb[16].mxu0 }
 0x108   : > { %v1434_v37 = vmax.f32 %v1306_v29, 0.0  ;;  %1692 = vst.msk [vmem:[%s2435_s5 + $0x70] sm:$0xff] %vm1677_vm3, %v1563_v30  ;;  %v1625_v39 = vmin.f32 %v1497_v31, 6.0  ;;  %v1564_v40 = vmin.f32 %v1436_v32, 6.0  ;;  %v1176_v42 = vmul.f32 %v2030_v38, %v2410_v6  ;;  %v2094_v43 = vpop.f32.mrb[16].mxu1  ;;  %v704_v44 = vpop.f32.mrb[17].mxu0 }
 0x109   : > { %v1498_v41 = vmax.f32 %v1370_v33, 0.0  ;;  %1756 = vst.msk [vmem:[%s2435_s5 + $0x270] sm:$0xff] %vm1677_vm3, %v1627_v34  ;;  %1690 = vst.msk [vmem:[%s2435_s5 + $0x60] sm:$0xff] %vm1677_vm3, %v1561_v35  ;;  %v1628_v45 = vmin.f32 %v1500_v36, 6.0  ;;  %v1240_v47 = vmul.f32 %v2094_v43, %v2410_v6  ;;  %v1174_v48 = vmul.f32 %v2410_v6, %v704_v44  ;;  %v960_v49 = vpop.f32.mrb[17].mxu1  ;;  %v2031_v50 = vpop.f32.mrb[18].mxu0 }
 0x10a   : > { %v1562_v46 = vmin.f32 %v1434_v37, 6.0  ;;  %1754 = vst.msk [vmem:[%s2435_s5 + $0x260] sm:$0xff] %vm1677_vm3, %v1625_v39  ;;  %1693 = vst.msk [vmem:[%s2435_s5 + $0x78] sm:$0xff] %vm1677_vm3, %v1564_v40  ;;  %v1311_v52 = vadd.f32 %v2415_v8, %v1176_v42  ;;  %v1238_v53 = vmul.f32 %v2410_v6, %v960_v49  ;;  %v1177_v54 = vmul.f32 %v2031_v50, %v2410_v6  ;;  %v2095_v55 = vpop.f32.mrb[18].mxu1  ;;  %v707_v56 = vpop.f32.mrb[19].mxu0 }
 0x10b   : > { %v1626_v51 = vmin.f32 %v1498_v41, 6.0  ;;  %1757 = vst.msk [vmem:[%s2435_s5 + $0x278] sm:$0xff] %vm1677_vm3, %v1628_v45  ;;  %v1375_v57 = vadd.f32 %v2415_v8, %v1240_v47  ;;  %v1309_v58 = vadd.f32 %v2415_v8, %v1174_v48  ;;  %v1241_v59 = vmul.f32 %v2095_v55, %v2410_v6  ;;  %v963_v61 = vpop.f32.mrb[19].mxu1 }
 0x10c   : > { %1691 = vst.msk [vmem:[%s2435_s5 + $0x68] sm:$0xff] %vm1677_vm3, %v1562_v46  ;;  %v1175_v60 = vmul.f32 %v2410_v6, %v707_v56  ;;  %v1439_v62 = vmax.f32 %v1311_v52, 0.0  ;;  %v1373_v63 = vadd.f32 %v2415_v8, %v1238_v53  ;;  %v1312_v0 = vadd.f32 %v2415_v8, %v1177_v54 }
 0x10d   : > { %1755 = vst.msk [vmem:[%s2435_s5 + $0x268] sm:$0xff] %vm1677_vm3, %v1626_v51  ;;  %v1239_v1 = vmul.f32 %v2410_v6, %v963_v61  ;;  %v1503_v2 = vmax.f32 %v1375_v57, 0.0  ;;  %v1437_v3 = vmax.f32 %v1309_v58, 0.0  ;;  %v1376_v4 = vadd.f32 %v2415_v8, %v1241_v59 }
 0x10e   : > { %v1310_v5 = vadd.f32 %v2415_v8, %v1175_v60  ;;  %v1567_v7 = vmin.f32 %v1439_v62, 6.0  ;;  %v1501_v9 = vmax.f32 %v1373_v63, 0.0  ;;  %v1440_v10 = vmax.f32 %v1312_v0, 0.0 }
 0x10f   : > { %v1374_v11 = vadd.f32 %v2415_v8, %v1239_v1  ;;  %v1631_v12 = vmin.f32 %v1503_v2, 6.0  ;;  %v1565_v13 = vmin.f32 %v1437_v3, 6.0  ;;  %v1504_v14 = vmax.f32 %v1376_v4, 0.0  ;;  %v2034_v16 = vpop.f32.mrb[20].mxu0 }
 0x110   : > { %v1438_v15 = vmax.f32 %v1310_v5, 0.0  ;;  %1696 = vst.msk [vmem:[%s2435_s5 + $0x90] sm:$0xff] %vm1677_vm3, %v1567_v7  ;;  %v1629_v17 = vmin.f32 %v1501_v9, 6.0  ;;  %v1568_v18 = vmin.f32 %v1440_v10, 6.0  ;;  %v1180_v20 = vmul.f32 %v2034_v16, %v2410_v6  ;;  %v2098_v21 = vpop.f32.mrb[20].mxu1  ;;  %v720_v22 = vpop.f32.mrb[21].mxu0 }
 0x111   : > { %v1502_v19 = vmax.f32 %v1374_v11, 0.0  ;;  %1760 = vst.msk [vmem:[%s2435_s5 + $0x290] sm:$0xff] %vm1677_vm3, %v1631_v12  ;;  %1694 = vst.msk [vmem:[%s2435_s5 + $0x80] sm:$0xff] %vm1677_vm3, %v1565_v13  ;;  %v1632_v23 = vmin.f32 %v1504_v14, 6.0  ;;  %v1244_v25 = vmul.f32 %v2098_v21, %v2410_v6  ;;  %v1178_v26 = vmul.f32 %v2410_v6, %v720_v22  ;;  %v976_v27 = vpop.f32.mrb[21].mxu1  ;;  %v2035_v28 = vpop.f32.mrb[22].mxu0 }
 0x112   : > { %v1566_v24 = vmin.f32 %v1438_v15, 6.0  ;;  %1758 = vst.msk [vmem:[%s2435_s5 + $0x280] sm:$0xff] %vm1677_vm3, %v1629_v17  ;;  %1697 = vst.msk [vmem:[%s2435_s5 + $0x98] sm:$0xff] %vm1677_vm3, %v1568_v18  ;;  %v1315_v30 = vadd.f32 %v2415_v8, %v1180_v20  ;;  %v1242_v31 = vmul.f32 %v2410_v6, %v976_v27  ;;  %v1181_v32 = vmul.f32 %v2035_v28, %v2410_v6  ;;  %v2099_v33 = vpop.f32.mrb[22].mxu1  ;;  %v723_v34 = vpop.f32.mrb[23].mxu0 }
 0x113   : > { %v1630_v29 = vmin.f32 %v1502_v19, 6.0  ;;  %1761 = vst.msk [vmem:[%s2435_s5 + $0x298] sm:$0xff] %vm1677_vm3, %v1632_v23  ;;  %v1379_v35 = vadd.f32 %v2415_v8, %v1244_v25  ;;  %v1313_v36 = vadd.f32 %v2415_v8, %v1178_v26  ;;  %v1245_v37 = vmul.f32 %v2099_v33, %v2410_v6  ;;  %v979_v39 = vpop.f32.mrb[23].mxu1 }
 0x114   : > { %1695 = vst.msk [vmem:[%s2435_s5 + $0x88] sm:$0xff] %vm1677_vm3, %v1566_v24  ;;  %v1179_v38 = vmul.f32 %v2410_v6, %v723_v34  ;;  %v1443_v40 = vmax.f32 %v1315_v30, 0.0  ;;  %v1377_v41 = vadd.f32 %v2415_v8, %v1242_v31  ;;  %v1316_v42 = vadd.f32 %v2415_v8, %v1181_v32 }
 0x115   : > { %1759 = vst.msk [vmem:[%s2435_s5 + $0x288] sm:$0xff] %vm1677_vm3, %v1630_v29  ;;  %v1243_v43 = vmul.f32 %v2410_v6, %v979_v39  ;;  %v1507_v44 = vmax.f32 %v1379_v35, 0.0  ;;  %v1441_v45 = vmax.f32 %v1313_v36, 0.0  ;;  %v1380_v46 = vadd.f32 %v2415_v8, %v1245_v37 }
 0x116   : > { %v1314_v47 = vadd.f32 %v2415_v8, %v1179_v38  ;;  %v1571_v48 = vmin.f32 %v1443_v40, 6.0  ;;  %v1505_v49 = vmax.f32 %v1377_v41, 0.0  ;;  %v1444_v50 = vmax.f32 %v1316_v42, 0.0 }
 0x117   : > { %v1378_v51 = vadd.f32 %v2415_v8, %v1243_v43  ;;  %v1635_v52 = vmin.f32 %v1507_v44, 6.0  ;;  %v1569_v53 = vmin.f32 %v1441_v45, 6.0  ;;  %v1508_v54 = vmax.f32 %v1380_v46, 0.0  ;;  %v2038_v56 = vpop.f32.mrb[24].mxu0 }
 0x118   : > { %v1442_v55 = vmax.f32 %v1314_v47, 0.0  ;;  %1700 = vst.msk [vmem:[%s2435_s5 + $0xb0] sm:$0xff] %vm1677_vm3, %v1571_v48  ;;  %v1633_v57 = vmin.f32 %v1505_v49, 6.0  ;;  %v1572_v58 = vmin.f32 %v1444_v50, 6.0  ;;  %v1184_v60 = vmul.f32 %v2038_v56, %v2410_v6  ;;  %v2102_v61 = vpop.f32.mrb[24].mxu1  ;;  %v736_v62 = vpop.f32.mrb[25].mxu0 }
 0x119   : > { %v1506_v59 = vmax.f32 %v1378_v51, 0.0  ;;  %1764 = vst.msk [vmem:[%s2435_s5 + $0x2b0] sm:$0xff] %vm1677_vm3, %v1635_v52  ;;  %1698 = vst.msk [vmem:[%s2435_s5 + $0xa0] sm:$0xff] %vm1677_vm3, %v1569_v53  ;;  %v1636_v63 = vmin.f32 %v1508_v54, 6.0  ;;  %v1248_v1 = vmul.f32 %v2102_v61, %v2410_v6  ;;  %v1182_v2 = vmul.f32 %v2410_v6, %v736_v62  ;;  %v992_v3 = vpop.f32.mrb[25].mxu1  ;;  %v2039_v4 = vpop.f32.mrb[26].mxu0 }
 0x11a   : > { %v1570_v0 = vmin.f32 %v1442_v55, 6.0  ;;  %1762 = vst.msk [vmem:[%s2435_s5 + $0x2a0] sm:$0xff] %vm1677_vm3, %v1633_v57  ;;  %1701 = vst.msk [vmem:[%s2435_s5 + $0xb8] sm:$0xff] %vm1677_vm3, %v1572_v58  ;;  %v1319_v7 = vadd.f32 %v2415_v8, %v1184_v60  ;;  %v1246_v9 = vmul.f32 %v2410_v6, %v992_v3  ;;  %v1185_v10 = vmul.f32 %v2039_v4, %v2410_v6  ;;  %v2103_v11 = vpop.f32.mrb[26].mxu1  ;;  %v739_v12 = vpop.f32.mrb[27].mxu0 }
 0x11b   : > { %v1634_v5 = vmin.f32 %v1506_v59, 6.0  ;;  %1765 = vst.msk [vmem:[%s2435_s5 + $0x2b8] sm:$0xff] %vm1677_vm3, %v1636_v63  ;;  %v1383_v13 = vadd.f32 %v2415_v8, %v1248_v1  ;;  %v1317_v14 = vadd.f32 %v2415_v8, %v1182_v2  ;;  %v1249_v15 = vmul.f32 %v2103_v11, %v2410_v6  ;;  %v995_v17 = vpop.f32.mrb[27].mxu1 }
 0x11c   : > { %1699 = vst.msk [vmem:[%s2435_s5 + $0xa8] sm:$0xff] %vm1677_vm3, %v1570_v0  ;;  %v1183_v16 = vmul.f32 %v2410_v6, %v739_v12  ;;  %v1447_v18 = vmax.f32 %v1319_v7, 0.0  ;;  %v1381_v19 = vadd.f32 %v2415_v8, %v1246_v9  ;;  %v1320_v20 = vadd.f32 %v2415_v8, %v1185_v10 }
 0x11d   : > { %1763 = vst.msk [vmem:[%s2435_s5 + $0x2a8] sm:$0xff] %vm1677_vm3, %v1634_v5  ;;  %v1247_v21 = vmul.f32 %v2410_v6, %v995_v17  ;;  %v1511_v22 = vmax.f32 %v1383_v13, 0.0  ;;  %v1445_v23 = vmax.f32 %v1317_v14, 0.0  ;;  %v1384_v24 = vadd.f32 %v2415_v8, %v1249_v15 }
 0x11e   : > { %v1318_v25 = vadd.f32 %v2415_v8, %v1183_v16  ;;  %v1575_v26 = vmin.f32 %v1447_v18, 6.0  ;;  %v1509_v27 = vmax.f32 %v1381_v19, 0.0  ;;  %v1448_v28 = vmax.f32 %v1320_v20, 0.0 }
 0x11f   : > { %v1382_v29 = vadd.f32 %v2415_v8, %v1247_v21  ;;  %v1639_v30 = vmin.f32 %v1511_v22, 6.0  ;;  %v1573_v31 = vmin.f32 %v1445_v23, 6.0  ;;  %v1512_v32 = vmax.f32 %v1384_v24, 0.0  ;;  %v2042_v34 = vpop.f32.mrb[28].mxu0 }
 0x120   : > { %v1446_v33 = vmax.f32 %v1318_v25, 0.0  ;;  %1704 = vst.msk [vmem:[%s2435_s5 + $0xd0] sm:$0xff] %vm1677_vm3, %v1575_v26  ;;  %v1637_v35 = vmin.f32 %v1509_v27, 6.0  ;;  %v1576_v36 = vmin.f32 %v1448_v28, 6.0  ;;  %v1188_v38 = vmul.f32 %v2042_v34, %v2410_v6  ;;  %v2106_v39 = vpop.f32.mrb[28].mxu1  ;;  %v752_v40 = vpop.f32.mrb[29].mxu0 }
 0x121   : > { %v1510_v37 = vmax.f32 %v1382_v29, 0.0  ;;  %1768 = vst.msk [vmem:[%s2435_s5 + $0x2d0] sm:$0xff] %vm1677_vm3, %v1639_v30  ;;  %1702 = vst.msk [vmem:[%s2435_s5 + $0xc0] sm:$0xff] %vm1677_vm3, %v1573_v31  ;;  %v1640_v41 = vmin.f32 %v1512_v32, 6.0  ;;  %v1252_v43 = vmul.f32 %v2106_v39, %v2410_v6  ;;  %v1186_v44 = vmul.f32 %v2410_v6, %v752_v40  ;;  %v1008_v45 = vpop.f32.mrb[29].mxu1  ;;  %v2043_v46 = vpop.f32.mrb[30].mxu0 }
 0x122   : > { %v1574_v42 = vmin.f32 %v1446_v33, 6.0  ;;  %1766 = vst.msk [vmem:[%s2435_s5 + $0x2c0] sm:$0xff] %vm1677_vm3, %v1637_v35  ;;  %1705 = vst.msk [vmem:[%s2435_s5 + $0xd8] sm:$0xff] %vm1677_vm3, %v1576_v36  ;;  %v1323_v48 = vadd.f32 %v2415_v8, %v1188_v38  ;;  %v1250_v49 = vmul.f32 %v2410_v6, %v1008_v45  ;;  %v1189_v50 = vmul.f32 %v2043_v46, %v2410_v6  ;;  %v2107_v51 = vpop.f32.mrb[30].mxu1  ;;  %v755_v52 = vpop.f32.mrb[31].mxu0 }
 0x123   : > { %v1638_v47 = vmin.f32 %v1510_v37, 6.0  ;;  %1769 = vst.msk [vmem:[%s2435_s5 + $0x2d8] sm:$0xff] %vm1677_vm3, %v1640_v41  ;;  %v1387_v53 = vadd.f32 %v2415_v8, %v1252_v43  ;;  %v1321_v54 = vadd.f32 %v2415_v8, %v1186_v44  ;;  %v1253_v55 = vmul.f32 %v2107_v51, %v2410_v6  ;;  %v1011_v57 = vpop.f32.mrb[31].mxu1 }
 0x124   : > { %1703 = vst.msk [vmem:[%s2435_s5 + $0xc8] sm:$0xff] %vm1677_vm3, %v1574_v42  ;;  %v1187_v56 = vmul.f32 %v2410_v6, %v755_v52  ;;  %v1451_v58 = vmax.f32 %v1323_v48, 0.0  ;;  %v1385_v59 = vadd.f32 %v2415_v8, %v1250_v49  ;;  %v1324_v60 = vadd.f32 %v2415_v8, %v1189_v50 }
 0x125   : > { %1767 = vst.msk [vmem:[%s2435_s5 + $0x2c8] sm:$0xff] %vm1677_vm3, %v1638_v47  ;;  %v1251_v61 = vmul.f32 %v2410_v6, %v1011_v57  ;;  %v1515_v62 = vmax.f32 %v1387_v53, 0.0  ;;  %v1449_v63 = vmax.f32 %v1321_v54, 0.0  ;;  %v1388_v0 = vadd.f32 %v2415_v8, %v1253_v55 }
 0x126   : > { %v1322_v1 = vadd.f32 %v2415_v8, %v1187_v56  ;;  %v1579_v2 = vmin.f32 %v1451_v58, 6.0  ;;  %v1513_v3 = vmax.f32 %v1385_v59, 0.0  ;;  %v1452_v4 = vmax.f32 %v1324_v60, 0.0 }
 0x127   : > { %v1386_v5 = vadd.f32 %v2415_v8, %v1251_v61  ;;  %v1643_v7 = vmin.f32 %v1515_v62, 6.0  ;;  %v1577_v9 = vmin.f32 %v1449_v63, 6.0  ;;  %v1516_v10 = vmax.f32 %v1388_v0, 0.0  ;;  %v2046_v12 = vpop.f32.mrb[32].mxu0 }
 0x128   : > { %v1450_v11 = vmax.f32 %v1322_v1, 0.0  ;;  %1708 = vst.msk [vmem:[%s2435_s5 + $0xf0] sm:$0xff] %vm1677_vm3, %v1579_v2  ;;  %v1641_v13 = vmin.f32 %v1513_v3, 6.0  ;;  %v1580_v14 = vmin.f32 %v1452_v4, 6.0  ;;  %v1192_v16 = vmul.f32 %v2046_v12, %v2410_v6  ;;  %v2110_v17 = vpop.f32.mrb[32].mxu1  ;;  %v768_v18 = vpop.f32.mrb[33].mxu0 }
 0x129   : > { %v1514_v15 = vmax.f32 %v1386_v5, 0.0  ;;  %1772 = vst.msk [vmem:[%s2435_s5 + $0x2f0] sm:$0xff] %vm1677_vm3, %v1643_v7  ;;  %1706 = vst.msk [vmem:[%s2435_s5 + $0xe0] sm:$0xff] %vm1677_vm3, %v1577_v9  ;;  %v1644_v19 = vmin.f32 %v1516_v10, 6.0  ;;  %v1256_v21 = vmul.f32 %v2110_v17, %v2410_v6  ;;  %v1190_v22 = vmul.f32 %v2410_v6, %v768_v18  ;;  %v1024_v23 = vpop.f32.mrb[33].mxu1  ;;  %v2047_v24 = vpop.f32.mrb[34].mxu0 }
 0x12a   : > { %v1578_v20 = vmin.f32 %v1450_v11, 6.0  ;;  %1770 = vst.msk [vmem:[%s2435_s5 + $0x2e0] sm:$0xff] %vm1677_vm3, %v1641_v13  ;;  %1709 = vst.msk [vmem:[%s2435_s5 + $0xf8] sm:$0xff] %vm1677_vm3, %v1580_v14  ;;  %v1327_v26 = vadd.f32 %v2415_v8, %v1192_v16  ;;  %v1254_v27 = vmul.f32 %v2410_v6, %v1024_v23  ;;  %v1193_v28 = vmul.f32 %v2047_v24, %v2410_v6  ;;  %v2111_v29 = vpop.f32.mrb[34].mxu1  ;;  %v771_v30 = vpop.f32.mrb[35].mxu0 }
 0x12b   : > { %v1642_v25 = vmin.f32 %v1514_v15, 6.0  ;;  %1773 = vst.msk [vmem:[%s2435_s5 + $0x2f8] sm:$0xff] %vm1677_vm3, %v1644_v19  ;;  %v1391_v31 = vadd.f32 %v2415_v8, %v1256_v21  ;;  %v1325_v32 = vadd.f32 %v2415_v8, %v1190_v22  ;;  %v1257_v33 = vmul.f32 %v2111_v29, %v2410_v6  ;;  %v1027_v35 = vpop.f32.mrb[35].mxu1 }
 0x12c   : > { %1707 = vst.msk [vmem:[%s2435_s5 + $0xe8] sm:$0xff] %vm1677_vm3, %v1578_v20  ;;  %v1191_v34 = vmul.f32 %v2410_v6, %v771_v30  ;;  %v1455_v36 = vmax.f32 %v1327_v26, 0.0  ;;  %v1389_v37 = vadd.f32 %v2415_v8, %v1254_v27  ;;  %v1328_v38 = vadd.f32 %v2415_v8, %v1193_v28 }
 0x12d   : > { %1771 = vst.msk [vmem:[%s2435_s5 + $0x2e8] sm:$0xff] %vm1677_vm3, %v1642_v25  ;;  %v1255_v39 = vmul.f32 %v2410_v6, %v1027_v35  ;;  %v1519_v40 = vmax.f32 %v1391_v31, 0.0  ;;  %v1453_v41 = vmax.f32 %v1325_v32, 0.0  ;;  %v1392_v42 = vadd.f32 %v2415_v8, %v1257_v33 }
 0x12e   : > { %v1326_v43 = vadd.f32 %v2415_v8, %v1191_v34  ;;  %v1583_v44 = vmin.f32 %v1455_v36, 6.0  ;;  %v1517_v45 = vmax.f32 %v1389_v37, 0.0  ;;  %v1456_v46 = vmax.f32 %v1328_v38, 0.0 }
 0x12f   : > { %v1390_v47 = vadd.f32 %v2415_v8, %v1255_v39  ;;  %v1647_v48 = vmin.f32 %v1519_v40, 6.0  ;;  %v1581_v49 = vmin.f32 %v1453_v41, 6.0  ;;  %v1520_v50 = vmax.f32 %v1392_v42, 0.0  ;;  %v2050_v52 = vpop.f32.mrb[36].mxu0 }
 0x130   : > { %v1454_v51 = vmax.f32 %v1326_v43, 0.0  ;;  %1712 = vst.msk [vmem:[%s2435_s5 + $0x110] sm:$0xff] %vm1677_vm3, %v1583_v44  ;;  %v1645_v53 = vmin.f32 %v1517_v45, 6.0  ;;  %v1584_v54 = vmin.f32 %v1456_v46, 6.0  ;;  %v1196_v56 = vmul.f32 %v2050_v52, %v2410_v6  ;;  %v2114_v57 = vpop.f32.mrb[36].mxu1  ;;  %v784_v58 = vpop.f32.mrb[37].mxu0 }
 0x131   : > { %v1518_v55 = vmax.f32 %v1390_v47, 0.0  ;;  %1776 = vst.msk [vmem:[%s2435_s5 + $0x310] sm:$0xff] %vm1677_vm3, %v1647_v48  ;;  %1710 = vst.msk [vmem:[%s2435_s5 + $0x100] sm:$0xff] %vm1677_vm3, %v1581_v49  ;;  %v1648_v59 = vmin.f32 %v1520_v50, 6.0  ;;  %v1260_v61 = vmul.f32 %v2114_v57, %v2410_v6  ;;  %v1194_v62 = vmul.f32 %v2410_v6, %v784_v58  ;;  %v1040_v63 = vpop.f32.mrb[37].mxu1  ;;  %v2051_v0 = vpop.f32.mrb[38].mxu0 }
 0x132   : > { %v1582_v60 = vmin.f32 %v1454_v51, 6.0  ;;  %1774 = vst.msk [vmem:[%s2435_s5 + $0x300] sm:$0xff] %vm1677_vm3, %v1645_v53  ;;  %1713 = vst.msk [vmem:[%s2435_s5 + $0x118] sm:$0xff] %vm1677_vm3, %v1584_v54  ;;  %v1331_v2 = vadd.f32 %v2415_v8, %v1196_v56  ;;  %v1258_v3 = vmul.f32 %v2410_v6, %v1040_v63  ;;  %v1197_v4 = vmul.f32 %v2051_v0, %v2410_v6  ;;  %v2115_v5 = vpop.f32.mrb[38].mxu1  ;;  %v787_v7 = vpop.f32.mrb[39].mxu0 }
 0x133   : > { %v1646_v1 = vmin.f32 %v1518_v55, 6.0  ;;  %1777 = vst.msk [vmem:[%s2435_s5 + $0x318] sm:$0xff] %vm1677_vm3, %v1648_v59  ;;  %v1395_v9 = vadd.f32 %v2415_v8, %v1260_v61  ;;  %v1329_v10 = vadd.f32 %v2415_v8, %v1194_v62  ;;  %v1261_v11 = vmul.f32 %v2115_v5, %v2410_v6  ;;  %v1043_v13 = vpop.f32.mrb[39].mxu1 }
 0x134   : > { %1711 = vst.msk [vmem:[%s2435_s5 + $0x108] sm:$0xff] %vm1677_vm3, %v1582_v60  ;;  %v1195_v12 = vmul.f32 %v2410_v6, %v787_v7  ;;  %v1459_v14 = vmax.f32 %v1331_v2, 0.0  ;;  %v1393_v15 = vadd.f32 %v2415_v8, %v1258_v3  ;;  %v1332_v16 = vadd.f32 %v2415_v8, %v1197_v4 }
 0x135   : > { %1775 = vst.msk [vmem:[%s2435_s5 + $0x308] sm:$0xff] %vm1677_vm3, %v1646_v1  ;;  %v1259_v17 = vmul.f32 %v2410_v6, %v1043_v13  ;;  %v1523_v18 = vmax.f32 %v1395_v9, 0.0  ;;  %v1457_v19 = vmax.f32 %v1329_v10, 0.0  ;;  %v1396_v20 = vadd.f32 %v2415_v8, %v1261_v11  ;;  %v2765_v11 = vld [vmem:[%s2951_s2] ss:$0 sm:$0xff] }
 0x136   : > { %v1330_v21 = vadd.f32 %v2415_v8, %v1195_v12  ;;  %v1587_v22 = vmin.f32 %v1459_v14, 6.0  ;;  %v1521_v23 = vmax.f32 %v1393_v15, 0.0  ;;  %v1460_v24 = vmax.f32 %v1332_v16, 0.0 }
 0x137   : > { %v1394_v25 = vadd.f32 %v2415_v8, %v1259_v17  ;;  %v1651_v26 = vmin.f32 %v1523_v18, 6.0  ;;  %v1585_v27 = vmin.f32 %v1457_v19, 6.0  ;;  %v1524_v28 = vmax.f32 %v1396_v20, 0.0  ;;  %v2054_v30 = vpop.f32.mrb[40].mxu0 }
 0x138   : > { %v1458_v29 = vmax.f32 %v1330_v21, 0.0  ;;  %1716 = vst.msk [vmem:[%s2435_s5 + $0x130] sm:$0xff] %vm1677_vm3, %v1587_v22  ;;  %v1649_v31 = vmin.f32 %v1521_v23, 6.0  ;;  %v1588_v32 = vmin.f32 %v1460_v24, 6.0  ;;  %v1200_v34 = vmul.f32 %v2054_v30, %v2410_v6  ;;  %v2118_v35 = vpop.f32.mrb[40].mxu1  ;;  %v800_v36 = vpop.f32.mrb[41].mxu0 }
 0x139   : > { %v1522_v33 = vmax.f32 %v1394_v25, 0.0  ;;  %1780 = vst.msk [vmem:[%s2435_s5 + $0x330] sm:$0xff] %vm1677_vm3, %v1651_v26  ;;  %1714 = vst.msk [vmem:[%s2435_s5 + $0x120] sm:$0xff] %vm1677_vm3, %v1585_v27  ;;  %v1652_v37 = vmin.f32 %v1524_v28, 6.0  ;;  %v1264_v39 = vmul.f32 %v2118_v35, %v2410_v6  ;;  %v1198_v40 = vmul.f32 %v2410_v6, %v800_v36  ;;  %v1056_v41 = vpop.f32.mrb[41].mxu1  ;;  %v2055_v42 = vpop.f32.mrb[42].mxu0 }
 0x13a   : > { %v1586_v38 = vmin.f32 %v1458_v29, 6.0  ;;  %1778 = vst.msk [vmem:[%s2435_s5 + $0x320] sm:$0xff] %vm1677_vm3, %v1649_v31  ;;  %1717 = vst.msk [vmem:[%s2435_s5 + $0x138] sm:$0xff] %vm1677_vm3, %v1588_v32  ;;  %v1335_v44 = vadd.f32 %v2415_v8, %v1200_v34  ;;  %v1262_v45 = vmul.f32 %v2410_v6, %v1056_v41  ;;  %v1201_v46 = vmul.f32 %v2055_v42, %v2410_v6  ;;  %v2119_v47 = vpop.f32.mrb[42].mxu1  ;;  %v803_v48 = vpop.f32.mrb[43].mxu0 }
 0x13b   : > { %v1650_v43 = vmin.f32 %v1522_v33, 6.0  ;;  %1781 = vst.msk [vmem:[%s2435_s5 + $0x338] sm:$0xff] %vm1677_vm3, %v1652_v37  ;;  %v1399_v49 = vadd.f32 %v2415_v8, %v1264_v39  ;;  %v1333_v50 = vadd.f32 %v2415_v8, %v1198_v40  ;;  %v1265_v51 = vmul.f32 %v2119_v47, %v2410_v6  ;;  %v1059_v53 = vpop.f32.mrb[43].mxu1  ;;  %v2781_v21 = vld [vmem:[%s2952_s3] ss:$0 sm:$0xff] }
 0x13c   : > { %1715 = vst.msk [vmem:[%s2435_s5 + $0x128] sm:$0xff] %vm1677_vm3, %v1586_v38  ;;  %v1199_v52 = vmul.f32 %v2410_v6, %v803_v48  ;;  %v1463_v54 = vmax.f32 %v1335_v44, 0.0  ;;  %v1397_v55 = vadd.f32 %v2415_v8, %v1262_v45  ;;  %v1336_v56 = vadd.f32 %v2415_v8, %v1201_v46 }
 0x13d   : > { %1779 = vst.msk [vmem:[%s2435_s5 + $0x328] sm:$0xff] %vm1677_vm3, %v1650_v43  ;;  %v1263_v57 = vmul.f32 %v2410_v6, %v1059_v53  ;;  %v1527_v58 = vmax.f32 %v1399_v49, 0.0  ;;  %v1461_v59 = vmax.f32 %v1333_v50, 0.0  ;;  %v1400_v60 = vadd.f32 %v2415_v8, %v1265_v51 }
 0x13e   : > { %v1334_v61 = vadd.f32 %v2415_v8, %v1199_v52  ;;  %v1591_v62 = vmin.f32 %v1463_v54, 6.0  ;;  %v1525_v63 = vmax.f32 %v1397_v55, 0.0  ;;  %v1464_v0 = vmax.f32 %v1336_v56, 0.0 }
 0x13f   : > { %v1398_v1 = vadd.f32 %v2415_v8, %v1263_v57  ;;  %v1655_v2 = vmin.f32 %v1527_v58, 6.0  ;;  %v1589_v3 = vmin.f32 %v1461_v59, 6.0  ;;  %v1528_v4 = vmax.f32 %v1400_v60, 0.0  ;;  %v2058_v7 = vpop.f32.mrb[44].mxu0 }
 0x140   : > { %v1462_v5 = vmax.f32 %v1334_v61, 0.0  ;;  %1720 = vst.msk [vmem:[%s2435_s5 + $0x150] sm:$0xff] %vm1677_vm3, %v1591_v62  ;;  %v1653_v6 = vmin.f32 %v1525_v63, 6.0  ;;  %v1592_v9 = vmin.f32 %v1464_v0, 6.0  ;;  %v1204_v12 = vmul.f32 %v2765_v11, %v2058_v7  ;;  %v2122_v8 = vpop.f32.mrb[44].mxu1  ;;  %v816_v13 = vpop.f32.mrb[45].mxu0 }
 0x141   : > { %v1526_v10 = vmax.f32 %v1398_v1, 0.0  ;;  %1784 = vst.msk [vmem:[%s2435_s5 + $0x350] sm:$0xff] %vm1677_vm3, %v1655_v2  ;;  %1718 = vst.msk [vmem:[%s2435_s5 + $0x140] sm:$0xff] %vm1677_vm3, %v1589_v3  ;;  %v1656_v14 = vmin.f32 %v1528_v4, 6.0  ;;  %v1268_v16 = vmul.f32 %v2765_v11, %v2122_v8  ;;  %v1202_v17 = vmul.f32 %v2765_v11, %v816_v13  ;;  %v1072_v18 = vpop.f32.mrb[45].mxu1  ;;  %v2059_v19 = vpop.f32.mrb[46].mxu0 }
 0x142   : > { %v1590_v15 = vmin.f32 %v1462_v5, 6.0  ;;  %1782 = vst.msk [vmem:[%s2435_s5 + $0x340] sm:$0xff] %vm1677_vm3, %v1653_v6  ;;  %1721 = vst.msk [vmem:[%s2435_s5 + $0x158] sm:$0xff] %vm1677_vm3, %v1592_v9  ;;  %v1339_v22 = vadd.f32 %v2781_v21, %v1204_v12  ;;  %v1266_v23 = vmul.f32 %v2765_v11, %v1072_v18  ;;  %v1205_v24 = vmul.f32 %v2765_v11, %v2059_v19  ;;  %v2123_v25 = vpop.f32.mrb[46].mxu1  ;;  %v819_v26 = vpop.f32.mrb[47].mxu0 }
 0x143   : > { %v1654_v20 = vmin.f32 %v1526_v10, 6.0  ;;  %1785 = vst.msk [vmem:[%s2435_s5 + $0x358] sm:$0xff] %vm1677_vm3, %v1656_v14  ;;  %v1403_v27 = vadd.f32 %v2781_v21, %v1268_v16  ;;  %v1337_v28 = vadd.f32 %v2781_v21, %v1202_v17  ;;  %v1269_v29 = vmul.f32 %v2765_v11, %v2123_v25  ;;  %v1075_v31 = vpop.f32.mrb[47].mxu1 }
 0x144   : > { %1719 = vst.msk [vmem:[%s2435_s5 + $0x148] sm:$0xff] %vm1677_vm3, %v1590_v15  ;;  %v1203_v30 = vmul.f32 %v2765_v11, %v819_v26  ;;  %v1467_v32 = vmax.f32 %v1339_v22, 0.0  ;;  %v1401_v33 = vadd.f32 %v2781_v21, %v1266_v23  ;;  %v1340_v34 = vadd.f32 %v2781_v21, %v1205_v24 }
 0x145   : > { %1783 = vst.msk [vmem:[%s2435_s5 + $0x348] sm:$0xff] %vm1677_vm3, %v1654_v20  ;;  %v1267_v35 = vmul.f32 %v2765_v11, %v1075_v31  ;;  %v1531_v36 = vmax.f32 %v1403_v27, 0.0  ;;  %v1465_v37 = vmax.f32 %v1337_v28, 0.0  ;;  %v1404_v38 = vadd.f32 %v2781_v21, %v1269_v29 }
 0x146   : > { %v1338_v39 = vadd.f32 %v2781_v21, %v1203_v30  ;;  %v1595_v40 = vmin.f32 %v1467_v32, 6.0  ;;  %v1529_v41 = vmax.f32 %v1401_v33, 0.0  ;;  %v1468_v42 = vmax.f32 %v1340_v34, 0.0 }
 0x147   : > { %v1402_v43 = vadd.f32 %v2781_v21, %v1267_v35  ;;  %v1659_v44 = vmin.f32 %v1531_v36, 6.0  ;;  %v1593_v45 = vmin.f32 %v1465_v37, 6.0  ;;  %v1532_v46 = vmax.f32 %v1404_v38, 0.0  ;;  %v2062_v48 = vpop.f32.mrb[48].mxu0 }
 0x148   : > { %v1466_v47 = vmax.f32 %v1338_v39, 0.0  ;;  %1724 = vst.msk [vmem:[%s2435_s5 + $0x170] sm:$0xff] %vm1677_vm3, %v1595_v40  ;;  %v1657_v49 = vmin.f32 %v1529_v41, 6.0  ;;  %v1596_v50 = vmin.f32 %v1468_v42, 6.0  ;;  %v1208_v52 = vmul.f32 %v2765_v11, %v2062_v48  ;;  %v2126_v53 = vpop.f32.mrb[48].mxu1  ;;  %v832_v54 = vpop.f32.mrb[49].mxu0 }
 0x149   : > { %v1530_v51 = vmax.f32 %v1402_v43, 0.0  ;;  %1788 = vst.msk [vmem:[%s2435_s5 + $0x370] sm:$0xff] %vm1677_vm3, %v1659_v44  ;;  %1722 = vst.msk [vmem:[%s2435_s5 + $0x160] sm:$0xff] %vm1677_vm3, %v1593_v45  ;;  %v1660_v55 = vmin.f32 %v1532_v46, 6.0  ;;  %v1272_v57 = vmul.f32 %v2765_v11, %v2126_v53  ;;  %v1206_v58 = vmul.f32 %v2765_v11, %v832_v54  ;;  %v1088_v59 = vpop.f32.mrb[49].mxu1  ;;  %v2063_v60 = vpop.f32.mrb[50].mxu0 }
 0x14a   : > { %v1594_v56 = vmin.f32 %v1466_v47, 6.0  ;;  %1786 = vst.msk [vmem:[%s2435_s5 + $0x360] sm:$0xff] %vm1677_vm3, %v1657_v49  ;;  %1725 = vst.msk [vmem:[%s2435_s5 + $0x178] sm:$0xff] %vm1677_vm3, %v1596_v50  ;;  %v1343_v62 = vadd.f32 %v2781_v21, %v1208_v52  ;;  %v1270_v63 = vmul.f32 %v2765_v11, %v1088_v59  ;;  %v1209_v0 = vmul.f32 %v2765_v11, %v2063_v60  ;;  %v2127_v1 = vpop.f32.mrb[50].mxu1  ;;  %v835_v2 = vpop.f32.mrb[51].mxu0 }
 0x14b   : > { %v1658_v61 = vmin.f32 %v1530_v51, 6.0  ;;  %1789 = vst.msk [vmem:[%s2435_s5 + $0x378] sm:$0xff] %vm1677_vm3, %v1660_v55  ;;  %v1407_v3 = vadd.f32 %v2781_v21, %v1272_v57  ;;  %v1341_v4 = vadd.f32 %v2781_v21, %v1206_v58  ;;  %v1273_v5 = vmul.f32 %v2765_v11, %v2127_v1  ;;  %v1091_v6 = vpop.f32.mrb[51].mxu1 }
 0x14c   : > { %1723 = vst.msk [vmem:[%s2435_s5 + $0x168] sm:$0xff] %vm1677_vm3, %v1594_v56  ;;  %v1207_v7 = vmul.f32 %v2765_v11, %v835_v2  ;;  %v1471_v9 = vmax.f32 %v1343_v62, 0.0  ;;  %v1405_v10 = vadd.f32 %v2781_v21, %v1270_v63  ;;  %v1344_v12 = vadd.f32 %v2781_v21, %v1209_v0 }
 0x14d   : > { %1787 = vst.msk [vmem:[%s2435_s5 + $0x368] sm:$0xff] %vm1677_vm3, %v1658_v61  ;;  %v1271_v8 = vmul.f32 %v2765_v11, %v1091_v6  ;;  %v1535_v13 = vmax.f32 %v1407_v3, 0.0  ;;  %v1469_v14 = vmax.f32 %v1341_v4, 0.0  ;;  %v1408_v15 = vadd.f32 %v2781_v21, %v1273_v5 }
 0x14e   : > { %v1342_v16 = vadd.f32 %v2781_v21, %v1207_v7  ;;  %v1599_v17 = vmin.f32 %v1471_v9, 6.0  ;;  %v1533_v18 = vmax.f32 %v1405_v10, 0.0  ;;  %v1472_v19 = vmax.f32 %v1344_v12, 0.0 }
 0x14f   : > { %v1406_v20 = vadd.f32 %v2781_v21, %v1271_v8  ;;  %v1663_v22 = vmin.f32 %v1535_v13, 6.0  ;;  %v1597_v23 = vmin.f32 %v1469_v14, 6.0  ;;  %v1536_v24 = vmax.f32 %v1408_v15, 0.0  ;;  %v2066_v26 = vpop.f32.mrb[52].mxu0 }
 0x150   : > { %v1470_v25 = vmax.f32 %v1342_v16, 0.0  ;;  %1728 = vst.msk [vmem:[%s2435_s5 + $0x190] sm:$0xff] %vm1677_vm3, %v1599_v17  ;;  %v1661_v27 = vmin.f32 %v1533_v18, 6.0  ;;  %v1600_v28 = vmin.f32 %v1472_v19, 6.0  ;;  %v1212_v30 = vmul.f32 %v2765_v11, %v2066_v26  ;;  %v2130_v31 = vpop.f32.mrb[52].mxu1  ;;  %v848_v32 = vpop.f32.mrb[53].mxu0 }
 0x151   : > { %v1534_v29 = vmax.f32 %v1406_v20, 0.0  ;;  %1792 = vst.msk [vmem:[%s2435_s5 + $0x390] sm:$0xff] %vm1677_vm3, %v1663_v22  ;;  %1726 = vst.msk [vmem:[%s2435_s5 + $0x180] sm:$0xff] %vm1677_vm3, %v1597_v23  ;;  %v1664_v33 = vmin.f32 %v1536_v24, 6.0  ;;  %v1276_v35 = vmul.f32 %v2765_v11, %v2130_v31  ;;  %v1210_v36 = vmul.f32 %v2765_v11, %v848_v32  ;;  %v1104_v37 = vpop.f32.mrb[53].mxu1  ;;  %v2067_v38 = vpop.f32.mrb[54].mxu0 }
 0x152   : > { %v1598_v34 = vmin.f32 %v1470_v25, 6.0  ;;  %1790 = vst.msk [vmem:[%s2435_s5 + $0x380] sm:$0xff] %vm1677_vm3, %v1661_v27  ;;  %1729 = vst.msk [vmem:[%s2435_s5 + $0x198] sm:$0xff] %vm1677_vm3, %v1600_v28  ;;  %v1347_v40 = vadd.f32 %v2781_v21, %v1212_v30  ;;  %v1274_v41 = vmul.f32 %v2765_v11, %v1104_v37  ;;  %v1213_v42 = vmul.f32 %v2765_v11, %v2067_v38  ;;  %v2131_v43 = vpop.f32.mrb[54].mxu1  ;;  %v851_v44 = vpop.f32.mrb[55].mxu0 }
 0x153   : > { %v1662_v39 = vmin.f32 %v1534_v29, 6.0  ;;  %1793 = vst.msk [vmem:[%s2435_s5 + $0x398] sm:$0xff] %vm1677_vm3, %v1664_v33  ;;  %v1411_v45 = vadd.f32 %v2781_v21, %v1276_v35  ;;  %v1345_v46 = vadd.f32 %v2781_v21, %v1210_v36  ;;  %v1277_v47 = vmul.f32 %v2765_v11, %v2131_v43  ;;  %v1107_v49 = vpop.f32.mrb[55].mxu1 }
 0x154   : > { %1727 = vst.msk [vmem:[%s2435_s5 + $0x188] sm:$0xff] %vm1677_vm3, %v1598_v34  ;;  %v1211_v48 = vmul.f32 %v2765_v11, %v851_v44  ;;  %v1475_v50 = vmax.f32 %v1347_v40, 0.0  ;;  %v1409_v51 = vadd.f32 %v2781_v21, %v1274_v41  ;;  %v1348_v52 = vadd.f32 %v2781_v21, %v1213_v42 }
 0x155   : > { %1791 = vst.msk [vmem:[%s2435_s5 + $0x388] sm:$0xff] %vm1677_vm3, %v1662_v39  ;;  %v1275_v53 = vmul.f32 %v2765_v11, %v1107_v49  ;;  %v1539_v54 = vmax.f32 %v1411_v45, 0.0  ;;  %v1473_v55 = vmax.f32 %v1345_v46, 0.0  ;;  %v1412_v56 = vadd.f32 %v2781_v21, %v1277_v47 }
 0x156   : > { %v1346_v57 = vadd.f32 %v2781_v21, %v1211_v48  ;;  %v1603_v58 = vmin.f32 %v1475_v50, 6.0  ;;  %v1537_v59 = vmax.f32 %v1409_v51, 0.0  ;;  %v1476_v60 = vmax.f32 %v1348_v52, 0.0 }
 0x157   : > { %v1410_v61 = vadd.f32 %v2781_v21, %v1275_v53  ;;  %v1667_v62 = vmin.f32 %v1539_v54, 6.0  ;;  %v1601_v63 = vmin.f32 %v1473_v55, 6.0  ;;  %v1540_v0 = vmax.f32 %v1412_v56, 0.0  ;;  %v2070_v2 = vpop.f32.mrb[56].mxu0 }
 0x158   : > { %v1474_v1 = vmax.f32 %v1346_v57, 0.0  ;;  %1732 = vst.msk [vmem:[%s2435_s5 + $0x1b0] sm:$0xff] %vm1677_vm3, %v1603_v58  ;;  %v1665_v3 = vmin.f32 %v1537_v59, 6.0  ;;  %v1604_v4 = vmin.f32 %v1476_v60, 6.0  ;;  %v1216_v7 = vmul.f32 %v2765_v11, %v2070_v2  ;;  %v2134_v6 = vpop.f32.mrb[56].mxu1  ;;  %v864_v9 = vpop.f32.mrb[57].mxu0 }
 0x159   : > { %v1538_v5 = vmax.f32 %v1410_v61, 0.0  ;;  %1796 = vst.msk [vmem:[%s2435_s5 + $0x3b0] sm:$0xff] %vm1677_vm3, %v1667_v62  ;;  %1730 = vst.msk [vmem:[%s2435_s5 + $0x1a0] sm:$0xff] %vm1677_vm3, %v1601_v63  ;;  %v1668_v10 = vmin.f32 %v1540_v0, 6.0  ;;  %v1280_v8 = vmul.f32 %v2765_v11, %v2134_v6  ;;  %v1214_v13 = vmul.f32 %v2765_v11, %v864_v9  ;;  %v1120_v14 = vpop.f32.mrb[57].mxu1  ;;  %v2071_v15 = vpop.f32.mrb[58].mxu0 }
 0x15a   : > { %v1602_v12 = vmin.f32 %v1474_v1, 6.0  ;;  %1794 = vst.msk [vmem:[%s2435_s5 + $0x3a0] sm:$0xff] %vm1677_vm3, %v1665_v3  ;;  %1733 = vst.msk [vmem:[%s2435_s5 + $0x1b8] sm:$0xff] %vm1677_vm3, %v1604_v4  ;;  %v1351_v17 = vadd.f32 %v2781_v21, %v1216_v7  ;;  %v1278_v18 = vmul.f32 %v2765_v11, %v1120_v14  ;;  %v1217_v19 = vmul.f32 %v2765_v11, %v2071_v15  ;;  %v2135_v20 = vpop.f32.mrb[58].mxu1  ;;  %v867_v22 = vpop.f32.mrb[59].mxu0 }
 0x15b   : > { %v1666_v16 = vmin.f32 %v1538_v5, 6.0  ;;  %1797 = vst.msk [vmem:[%s2435_s5 + $0x3b8] sm:$0xff] %vm1677_vm3, %v1668_v10  ;;  %v1415_v23 = vadd.f32 %v2781_v21, %v1280_v8  ;;  %v1349_v24 = vadd.f32 %v2781_v21, %v1214_v13  ;;  %v1281_v25 = vmul.f32 %v2765_v11, %v2135_v20  ;;  %v1123_v27 = vpop.f32.mrb[59].mxu1 }
 0x15c   : > { %1731 = vst.msk [vmem:[%s2435_s5 + $0x1a8] sm:$0xff] %vm1677_vm3, %v1602_v12  ;;  %v1215_v26 = vmul.f32 %v2765_v11, %v867_v22  ;;  %v1479_v28 = vmax.f32 %v1351_v17, 0.0  ;;  %v1413_v29 = vadd.f32 %v2781_v21, %v1278_v18  ;;  %v1352_v30 = vadd.f32 %v2781_v21, %v1217_v19 }
 0x15d   : > { %1795 = vst.msk [vmem:[%s2435_s5 + $0x3a8] sm:$0xff] %vm1677_vm3, %v1666_v16  ;;  %v1279_v31 = vmul.f32 %v2765_v11, %v1123_v27  ;;  %v1543_v32 = vmax.f32 %v1415_v23, 0.0  ;;  %v1477_v33 = vmax.f32 %v1349_v24, 0.0  ;;  %v1416_v34 = vadd.f32 %v2781_v21, %v1281_v25 }
 0x15e   : > { %v1350_v35 = vadd.f32 %v2781_v21, %v1215_v26  ;;  %v1607_v36 = vmin.f32 %v1479_v28, 6.0  ;;  %v1541_v37 = vmax.f32 %v1413_v29, 0.0  ;;  %v1480_v38 = vmax.f32 %v1352_v30, 0.0 }
 0x15f   : > { %v1414_v39 = vadd.f32 %v2781_v21, %v1279_v31  ;;  %v1671_v40 = vmin.f32 %v1543_v32, 6.0  ;;  %v1605_v41 = vmin.f32 %v1477_v33, 6.0  ;;  %v1544_v42 = vmax.f32 %v1416_v34, 0.0  ;;  %v2074_v44 = vpop.f32.mrb[60].mxu0 }
 0x160   : > { %v1478_v43 = vmax.f32 %v1350_v35, 0.0  ;;  %1736 = vst.msk [vmem:[%s2435_s5 + $0x1d0] sm:$0xff] %vm1677_vm3, %v1607_v36  ;;  %v1669_v45 = vmin.f32 %v1541_v37, 6.0  ;;  %v1608_v46 = vmin.f32 %v1480_v38, 6.0  ;;  %v1220_v48 = vmul.f32 %v2765_v11, %v2074_v44  ;;  %v2138_v49 = vpop.f32.mrb[60].mxu1  ;;  %v880_v50 = vpop.f32.mrb[61].mxu0 }
 0x161   : > { %v1542_v47 = vmax.f32 %v1414_v39, 0.0  ;;  %1800 = vst.msk [vmem:[%s2435_s5 + $0x3d0] sm:$0xff] %vm1677_vm3, %v1671_v40  ;;  %1734 = vst.msk [vmem:[%s2435_s5 + $0x1c0] sm:$0xff] %vm1677_vm3, %v1605_v41  ;;  %v1672_v51 = vmin.f32 %v1544_v42, 6.0  ;;  %v1284_v53 = vmul.f32 %v2765_v11, %v2138_v49  ;;  %v1218_v54 = vmul.f32 %v2765_v11, %v880_v50  ;;  %v1136_v55 = vpop.f32.mrb[61].mxu1  ;;  %v2075_v56 = vpop.f32.mrb[62].mxu0 }
 0x162   : > { %v1606_v52 = vmin.f32 %v1478_v43, 6.0  ;;  %1798 = vst.msk [vmem:[%s2435_s5 + $0x3c0] sm:$0xff] %vm1677_vm3, %v1669_v45  ;;  %1737 = vst.msk [vmem:[%s2435_s5 + $0x1d8] sm:$0xff] %vm1677_vm3, %v1608_v46  ;;  %v1355_v58 = vadd.f32 %v2781_v21, %v1220_v48  ;;  %v1282_v59 = vmul.f32 %v2765_v11, %v1136_v55  ;;  %v1221_v60 = vmul.f32 %v2765_v11, %v2075_v56  ;;  %v2139_v61 = vpop.f32.mrb[62].mxu1  ;;  %v883_v62 = vpop.f32.mrb[63].mxu0 }
 0x163   : > { %v1670_v57 = vmin.f32 %v1542_v47, 6.0  ;;  %1801 = vst.msk [vmem:[%s2435_s5 + $0x3d8] sm:$0xff] %vm1677_vm3, %v1672_v51  ;;  %v1419_v63 = vadd.f32 %v2781_v21, %v1284_v53  ;;  %v1353_v0 = vadd.f32 %v2781_v21, %v1218_v54  ;;  %v1285_v1 = vmul.f32 %v2765_v11, %v2139_v61  ;;  %v1139_v3 = vpop.f32.mrb[63].mxu1 }
 0x164   : > { %1735 = vst.msk [vmem:[%s2435_s5 + $0x1c8] sm:$0xff] %vm1677_vm3, %v1606_v52  ;;  %v1219_v2 = vmul.f32 %v2765_v11, %v883_v62  ;;  %v1483_v4 = vmax.f32 %v1355_v58, 0.0  ;;  %v1417_v5 = vadd.f32 %v2781_v21, %v1282_v59  ;;  %v1356_v7 = vadd.f32 %v2781_v21, %v1221_v60 }
 0x165   : > { %1799 = vst.msk [vmem:[%s2435_s5 + $0x3c8] sm:$0xff] %vm1677_vm3, %v1670_v57  ;;  %v1283_v6 = vmul.f32 %v2765_v11, %v1139_v3  ;;  %v1547_v9 = vmax.f32 %v1419_v63, 0.0  ;;  %v1481_v10 = vmax.f32 %v1353_v0, 0.0  ;;  %v1420_v12 = vadd.f32 %v2781_v21, %v1285_v1 }
 0x166   : > { %v1354_v8 = vadd.f32 %v2781_v21, %v1219_v2  ;;  %v1611_v13 = vmin.f32 %v1483_v4, 6.0  ;;  %v1545_v14 = vmax.f32 %v1417_v5, 0.0  ;;  %v1484_v15 = vmax.f32 %v1356_v7, 0.0 }
 0x167   : > { %v1418_v16 = vadd.f32 %v2781_v21, %v1283_v6  ;;  %v1675_v17 = vmin.f32 %v1547_v9, 6.0  ;;  %v1609_v18 = vmin.f32 %v1481_v10, 6.0  ;;  %v1548_v11 = vmax.f32 %v1420_v12, 0.0 }
 0x168   : > { %v1482_v19 = vmax.f32 %v1354_v8, 0.0  ;;  %1740 = vst.msk [vmem:[%s2435_s5 + $0x1f0] sm:$0xff] %vm1677_vm3, %v1611_v13  ;;  %v1673_v20 = vmin.f32 %v1545_v14, 6.0  ;;  %v1612_v22 = vmin.f32 %v1484_v15, 6.0 }
 0x169   : > { %v1546_v23 = vmax.f32 %v1418_v16, 0.0  ;;  %1804 = vst.msk [vmem:[%s2435_s5 + $0x3f0] sm:$0xff] %vm1677_vm3, %v1675_v17  ;;  %1738 = vst.msk [vmem:[%s2435_s5 + $0x1e0] sm:$0xff] %vm1677_vm3, %v1609_v18  ;;  %v1676_v24 = vmin.f32 %v1548_v11, 6.0 }
 0x16a   : > { %v1610_v25 = vmin.f32 %v1482_v19, 6.0  ;;  %1802 = vst.msk [vmem:[%s2435_s5 + $0x3e0] sm:$0xff] %vm1677_vm3, %v1673_v20  ;;  %1741 = vst.msk [vmem:[%s2435_s5 + $0x1f8] sm:$0xff] %vm1677_vm3, %v1612_v22 }
 0x16b   : > { %v1674_v21 = vmin.f32 %v1546_v23, 6.0  ;;  %1805 = vst.msk [vmem:[%s2435_s5 + $0x3f8] sm:$0xff] %vm1677_vm3, %v1676_v24 }
 0x16c   : > { %1739 = vst.msk [vmem:[%s2435_s5 + $0x1e8] sm:$0xff] %vm1677_vm3, %v1610_v25 }
 0x16d   : > { %1803 = vst.msk [vmem:[%s2435_s5 + $0x3e8] sm:$0xff] %vm1677_vm3, %v1674_v21 }
 0x16e PF: > { %s14_s15 = sadd.s32 1, %s2163_s15  }
 0x16f   : > { %p11_p4 = scmp.ge.s32.totalorder %s14_s15, 4  }
 0x171   :  { %13 = sbr.rel (!%p11_p4) target bundleno = 1 (0x1), region = 66 }

</bundles_post_ra>
